<compile_context>
chip_gen: v7x
topology: tpu7x:2x2x1
jax: 0.10.0
libtpu: 0.0.40
codegen_flags: <defaults>
</compile_context>

<pallas_src>
import functools

import jax
import jax.numpy as jnp
from jax.experimental import pallas as pl
from jax.experimental.pallas import tpu as pltpu


def _round_up(x, m):
    return (x + m - 1) // m * m


def _conv_bn_act_kernel(x_ref, w_ref, scale_ref, bias_ref, o_ref,
                        *, k, s, d, tile_h, w_out, c1, act_type):
    """One grid step = one (batch*row-tile, c2-tile).

    x_ref:     (1, win_h, W_pad, C1)   overlapping row window (halo included)
    w_ref:     (k*k*C1, TN)            conv weight rows ordered (kh, kw, cin)
    scale_ref: (1, TN)  f32            folded BN scale = gamma / sqrt(var+eps)
    bias_ref:  (1, TN)  f32            folded BN bias  = beta - mean * scale
    o_ref:     (1, tile_h, W_out, TN)  lane-dense output tile (TN % 128 == 0)
    """
    x = x_ref[0]                                      # (win_h, W_pad, C1)

    # Build the im2col slab once per tile (fuses the k*k taps into one matmul).
    # Static slices; the explicit end bound guarantees exactly tile_h / w_out
    # elements even when the stride overshoots the window.
    taps = []
    for kh in range(k):
        for kw in range(k):
            taps.append(x[kh * d: kh * d + s * tile_h: s,
                          kw * d: kw * d + s * w_out: s, :])   # (tile_h, W_out, C1)
    im2col = jnp.concatenate(taps, axis=-1).reshape(tile_h * w_out, k * k * c1)

    # Single MXU matmul with contraction k*k*C1, f32 accumulation.
    acc = jnp.dot(im2col, w_ref[...], preferred_element_type=jnp.float32)

    # Fused BatchNorm (folded) + activation epilogue in f32.
    y = acc * scale_ref[...] + bias_ref[...]          # (M, TN) * (1, TN) broadcast
    if act_type == 'silu':
        y = y * jax.nn.sigmoid(y)
    elif act_type == 'lrelu':
        y = jnp.where(y >= 0, y, 0.1 * y)
    # act_type is None -> identity

    tn = o_ref.shape[-1]
    o_ref[0] = y.reshape(tile_h, w_out, tn).astype(o_ref.dtype)


def conv_bn_act(x_nchw, weight, gamma, beta, running_mean, running_var,
                *, k=1, p=0, s=1, d=1, act_type='silu', eps=1e-5,
                compute_dtype=jnp.bfloat16, tile_h=None):
    """Forward of the `Conv` module (groups=1 path), inference BN semantics.

    x_nchw: (N, C1, H, W) float32
    weight: (C2, C1, k, k) float32  (PyTorch Conv2d layout, bias=False)
    returns: (N, C2, H_out, W_out) float32
    """
    if act_type not in ('silu', 'lrelu', None):
        raise ValueError(f"unsupported act_type: {act_type!r}")

    n, c1, h, w = x_nchw.shape
    c2 = weight.shape[0]
    h_out = (h + 2 * p - d * (k - 1) - 1) // s + 1
    w_out = (w + 2 * p - d * (k - 1) - 1) // s + 1
    w_pad_t = w + 2 * p

    # ---- tiling choices -----------------------------------------------------
    c2_p = _round_up(c2, 128)                       # lane-dense output stores
    tn = 256 if (c2_p % 256 == 0) else 128          # MXU tile; 128 suits v5e too

    if tile_h is None:
        # Aim for >= ~512 rows in the flattened matmul M dim, bound per-step VMEM.
        tile_h = max(1, min(h_out, pl.cdiv(512, w_out)))
        itemsize = jnp.dtype(compute_dtype).itemsize

        def _step_bytes(th):
            win = (th - 1) * s + (k - 1) * d + 1
            return (win * w_pad_t * c1 * itemsize            # input window
                    + th * w_out * k * k * c1 * itemsize     # im2col slab
                    + 2 * th * w_out * tn * 4)               # f32 acc + out tile
        while tile_h > 1 and _step_bytes(tile_h) > 6 * 1024 * 1024:
            tile_h = max(1, tile_h // 2)

    n_rt = pl.cdiv(h_out, tile_h)
    h_out_p = n_rt * tile_h
    n_ct = c2_p // tn

    # ---- layout + padding (plain-JAX glue) ----------------------------------
    # NCHW -> NHWC, spatial zero pad; extra bottom rows so the last row tile's
    # input window stays in bounds (those extra output rows are sliced off).
    x_nhwc = jnp.transpose(x_nchw, (0, 2, 3, 1))
    h_need = (h_out_p - 1) * s + (k - 1) * d + 1
    pad_bottom = p + max(0, h_need - (h + 2 * p))
    x_pad = jnp.pad(x_nhwc, ((0, 0), (p, pad_bottom), (p, p), (0, 0)))
    x_pad = x_pad.astype(compute_dtype)

    # Overlapping row windows flattened with batch: (N*n_rt, win_h, W_pad, C1).
    # Only the halo rows are duplicated (~halo/(tile_h*s) extra HBM traffic).
    win_h = (tile_h - 1) * s + (k - 1) * d + 1
    idx = (jnp.arange(n_rt)[:, None] * (tile_h * s)
           + jnp.arange(win_h)[None, :]).reshape(-1)
    x_win = jnp.take(x_pad, idx, axis=1).reshape(n * n_rt, win_h, w_pad_t, c1)

    # Weight (C2, C1, kh, kw) -> (k*k*C1, C2), rows ordered (kh, kw, cin) to
    # match the in-kernel im2col concat order; pad C2 -> c2_p (zeros).
    w_flat = jnp.transpose(weight, (2, 3, 1, 0)).reshape(k * k * c1, c2)
    w_flat = jnp.pad(w_flat, ((0, 0), (0, c2_p - c2))).astype(compute_dtype)

    # Fold BatchNorm running stats into per-channel scale/bias (f32 epilogue).
    scale = (gamma / jnp.sqrt(running_var + eps)).astype(jnp.float32)
    bias = (beta.astype(jnp.float32) - running_mean.astype(jnp.float32) * scale)
    scale = jnp.pad(scale, (0, c2_p - c2)).reshape(1, c2_p)
    bias = jnp.pad(bias, (0, c2_p - c2)).reshape(1, c2_p)

    kernel = functools.partial(
        _conv_bn_act_kernel,
        k=k, s=s, d=d, tile_h=tile_h, w_out=w_out, c1=c1, act_type=act_type)

    out_tiles = pl.pallas_call(
        kernel,
        out_shape=jax.ShapeDtypeStruct((n * n_rt, tile_h, w_out, c2_p),
                                       jnp.float32),
        grid=(n * n_rt, n_ct),
        in_specs=[
            # Input window depends only on the tile index -> not re-DMA'd when
            # only ct changes; weight/scale/bias depend only on ct.
            pl.BlockSpec((1, win_h, w_pad_t, c1), lambda t, ct: (t, 0, 0, 0)),
            pl.BlockSpec((k * k * c1, tn), lambda t, ct: (0, ct)),
            pl.BlockSpec((1, tn), lambda t, ct: (0, ct)),
            pl.BlockSpec((1, tn), lambda t, ct: (0, ct)),
        ],
        out_specs=pl.BlockSpec((1, tile_h, w_out, tn),
                               lambda t, ct: (t, 0, 0, ct)),
        compiler_params=pltpu.CompilerParams(
            dimension_semantics=("parallel", "parallel"),
            vmem_limit_bytes=32 * 1024 * 1024),
    )(x_win, w_flat, scale, bias)

    out = out_tiles.reshape(n, h_out_p, w_out, c2_p)[:, :h_out, :, :c2]
    return jnp.transpose(out, (0, 3, 1, 2))      # back to NCHW


def _reference(x_nchw, weight, gamma, beta, running_mean, running_var,
               *, k, p, s, d, act_type, eps=1e-5):
    """Pure-JAX reference for correctness checking."""
    y = jax.lax.conv_general_dilated(
        x_nchw, weight,
        window_strides=(s, s), padding=((p, p), (p, p)),
        rhs_dilation=(d, d),
        dimension_numbers=('NCHW', 'OIHW', 'NCHW'))
    scale = (gamma / jnp.sqrt(running_var + eps)).reshape(1, -1, 1, 1)
    bias = (beta - running_mean * gamma / jnp.sqrt(running_var + eps)).reshape(1, -1, 1, 1)
    y = y * scale + bias
    if act_type == 'silu':
        y = y * jax.nn.sigmoid(y)
    elif act_type == 'lrelu':
        y = jnp.where(y >= 0, y, 0.1 * y)
    return y


if __name__ == "__main__":
    key = jax.random.PRNGKey(0)
    kx, kw3, kw1, kg, kb, km, kv = jax.random.split(key, 7)

    # Small, module-consistent shapes: Conv(c1=4, c2=8, k=3, p=1, s=1, 'silu')
    N, C1, H, W = 2, 4, 16, 16
    C2, K, P, S, D = 8, 3, 1, 1, 1

    x = jax.random.normal(kx, (N, C1, H, W), dtype=jnp.float32)
    w3 = jax.random.normal(kw3, (C2, C1, K, K), dtype=jnp.float32) * 0.1
    w1 = jax.random.normal(kw1, (C2, C1, 1, 1), dtype=jnp.float32) * 0.1
    gamma = jax.random.normal(kg, (C2,), dtype=jnp.float32) * 0.1 + 1.0
    beta = jax.random.normal(kb, (C2,), dtype=jnp.float32) * 0.1
    running_mean = jax.random.normal(km, (C2,), dtype=jnp.float32) * 0.1
    running_var = jax.random.uniform(kv, (C2,), dtype=jnp.float32,
                                     minval=0.5, maxval=1.5)

    # 1) k=3, p=1, SiLU — bf16 matmul operands (f32 accumulation + epilogue).
    out = conv_bn_act(x, w3, gamma, beta, running_mean, running_var,
                      k=K, p=P, s=S, d=D, act_type='silu',
                      compute_dtype=jnp.bfloat16)
    out = jax.block_until_ready(out)
    ref = _reference(x, w3, gamma, beta, running_mean, running_var,
                     k=K, p=P, s=S, d=D, act_type='silu')
    assert out.shape == ref.shape == (N, C2, H, W)
    assert jnp.allclose(out, ref, atol=3e-2, rtol=3e-2), "bf16 k=3 mismatch"

    # 2) same layer in full f32 (exact-path check).
    out32 = conv_bn_act(x, w3, gamma, beta, running_mean, running_var,
                        k=K, p=P, s=S, d=D, act_type='silu',
                        compute_dtype=jnp.float32)
    out32 = jax.block_until_ready(out32)
    assert jnp.allclose(out32, ref, atol=1e-4, rtol=1e-4), "f32 k=3 mismatch"

    # 3) module-default 1x1 conv (k=1, p=0) with LeakyReLU, f32.
    out11 = conv_bn_act(x, w1, gamma, beta, running_mean, running_var,
                        k=1, p=0, s=1, d=1, act_type='lrelu',
                        compute_dtype=jnp.float32)
    out11 = jax.block_until_ready(out11)
    ref11 = _reference(x, w1, gamma, beta, running_mean, running_var,
                       k=1, p=0, s=1, d=1, act_type='lrelu')
    assert out11.shape == ref11.shape == (N, C2, H, W)
    assert jnp.allclose(out11, ref11, atol=1e-4, rtol=1e-4), "k=1 mismatch"

    print("KERNEL_OK")
</pallas_src>

<mosaic_0001>
module attributes {stable_mosaic.version = 11 : i64} {
  func.func @_conv_bn_act_kernel(%arg0: i32, %arg1: i32, %arg2: memref<1x18x18x4xbf16, #tpu.memory_space<vmem>>, %arg3: memref<36x128xbf16, #tpu.memory_space<vmem>>, %arg4: memref<1x128xf32, #tpu.memory_space<vmem>>, %arg5: memref<1x128xf32, #tpu.memory_space<vmem>>, %arg6: memref<1x16x16x128xf32, #tpu.memory_space<vmem>>) attributes {dimension_semantics = [#tpu.dimension_semantics<parallel>, #tpu.dimension_semantics<parallel>], iteration_bounds = array<i64: 2, 1>, scalar_prefetch = 0 : i64, scratch_operands = 0 : i64, tpu.core_type = #tpu.core_type<tc>, window_params = [{transform_indices = @transform_0, window_bounds = array<i64: 1, 18, 18, 4>}, {transform_indices = @transform_1, window_bounds = array<i64: 36, 128>}, {transform_indices = @transform_2, window_bounds = array<i64: 1, 128>}, {transform_indices = @transform_3, window_bounds = array<i64: 1, 128>}, {transform_indices = @transform_4, window_bounds = array<i64: 1, 16, 16, 128>}]} {
    %c0 = arith.constant 0 : index
    %c0_0 = arith.constant 0 : index
    %c0_1 = arith.constant 0 : index
    %c0_2 = arith.constant 0 : index
    %0 = vector.load %arg2[%c0, %c0_0, %c0_1, %c0_2] : memref<1x18x18x4xbf16, #tpu.memory_space<vmem>>, vector<1x18x18x4xbf16>
    %1 = vector.shape_cast %0 : vector<1x18x18x4xbf16> to vector<18x18x4xbf16>
    %2 = vector.extract_strided_slice %1 {offsets = [0, 0, 0], sizes = [16, 16, 4], strides = [1, 1, 1]} : vector<18x18x4xbf16> to vector<16x16x4xbf16>
    %3 = vector.extract_strided_slice %1 {offsets = [0, 1, 0], sizes = [16, 16, 4], strides = [1, 1, 1]} : vector<18x18x4xbf16> to vector<16x16x4xbf16>
    %4 = vector.extract_strided_slice %1 {offsets = [0, 2, 0], sizes = [16, 16, 4], strides = [1, 1, 1]} : vector<18x18x4xbf16> to vector<16x16x4xbf16>
    %5 = vector.extract_strided_slice %1 {offsets = [1, 0, 0], sizes = [16, 16, 4], strides = [1, 1, 1]} : vector<18x18x4xbf16> to vector<16x16x4xbf16>
    %6 = vector.extract_strided_slice %1 {offsets = [1, 1, 0], sizes = [16, 16, 4], strides = [1, 1, 1]} : vector<18x18x4xbf16> to vector<16x16x4xbf16>
    %7 = vector.extract_strided_slice %1 {offsets = [1, 2, 0], sizes = [16, 16, 4], strides = [1, 1, 1]} : vector<18x18x4xbf16> to vector<16x16x4xbf16>
    %8 = vector.extract_strided_slice %1 {offsets = [2, 0, 0], sizes = [16, 16, 4], strides = [1, 1, 1]} : vector<18x18x4xbf16> to vector<16x16x4xbf16>
    %9 = vector.extract_strided_slice %1 {offsets = [2, 1, 0], sizes = [16, 16, 4], strides = [1, 1, 1]} : vector<18x18x4xbf16> to vector<16x16x4xbf16>
    %10 = vector.extract_strided_slice %1 {offsets = [2, 2, 0], sizes = [16, 16, 4], strides = [1, 1, 1]} : vector<18x18x4xbf16> to vector<16x16x4xbf16>
    %11 = tpu.concatenate %2, %3, %4, %5, %6, %7, %8, %9, %10 in 2 : vector<16x16x4xbf16>, vector<16x16x4xbf16>, vector<16x16x4xbf16>, vector<16x16x4xbf16>, vector<16x16x4xbf16>, vector<16x16x4xbf16>, vector<16x16x4xbf16>, vector<16x16x4xbf16>, vector<16x16x4xbf16> -> vector<16x16x36xbf16>
    %12 = vector.shape_cast %11 : vector<16x16x36xbf16> to vector<256x36xbf16>
    %c0_3 = arith.constant 0 : index
    %c0_4 = arith.constant 0 : index
    %13 = vector.load %arg3[%c0_3, %c0_4] : memref<36x128xbf16, #tpu.memory_space<vmem>>, vector<36x128xbf16>
    %cst = arith.constant dense<0.000000e+00> : vector<256x128xf32>
    %14 = tpu.matmul %12, %13, %cst {dimension_numbers = #tpu.dot_dimension_numbers<[1], [0], [0], [1], [0, 0, 1, 1], [], []>} : vector<256x36xbf16>, vector<36x128xbf16>, vector<256x128xf32> -> vector<256x128xf32>
    %c0_5 = arith.constant 0 : index
    %c0_6 = arith.constant 0 : index
    %15 = vector.load %arg4[%c0_5, %c0_6] : memref<1x128xf32, #tpu.memory_space<vmem>>, vector<1x128xf32>
    %16 = vector.broadcast %15 : vector<1x128xf32> to vector<256x128xf32>
    %17 = arith.mulf %14, %16 : vector<256x128xf32>
    %c0_7 = arith.constant 0 : index
    %c0_8 = arith.constant 0 : index
    %18 = vector.load %arg5[%c0_7, %c0_8] : memref<1x128xf32, #tpu.memory_space<vmem>>, vector<1x128xf32>
    %19 = vector.broadcast %18 : vector<1x128xf32> to vector<256x128xf32>
    %20 = arith.addf %17, %19 : vector<256x128xf32>
    %21 = arith.negf %20 : vector<256x128xf32>
    %22 = math.exp %21 : vector<256x128xf32>
    %cst_9 = arith.constant 1.000000e+00 : f32
    %23 = vector.broadcast %cst_9 : f32 to vector<256x128xf32>
    %24 = arith.addf %23, %22 : vector<256x128xf32>
    %25 = arith.divf %23, %24 : vector<256x128xf32>
    %26 = arith.mulf %20, %25 : vector<256x128xf32>
    %27 = vector.shape_cast %26 : vector<256x128xf32> to vector<16x16x128xf32>
    %c0_10 = arith.constant 0 : index
    %c0_11 = arith.constant 0 : index
    %c0_12 = arith.constant 0 : index
    %c0_13 = arith.constant 0 : index
    %28 = vector.load %arg6[%c0_10, %c0_11, %c0_12, %c0_13] : memref<1x16x16x128xf32, #tpu.memory_space<vmem>>, vector<1x16x16x128xf32>
    %29 = vector.shape_cast %28 : vector<1x16x16x128xf32> to vector<16x16x128xf32>
    %30 = vector.shape_cast %27 : vector<16x16x128xf32> to vector<1x16x16x128xf32>
    tpu.vector_store %arg6[%c0_10, %c0_11, %c0_12, %c0_13], %30 {strides = array<i32>} : memref<1x16x16x128xf32, #tpu.memory_space<vmem>>, vector<1x16x16x128xf32>,
    return
  }
  func.func @transform_0(%arg0: i32, %arg1: i32) -> (i32, i32, i32, i32) {
    %c0_i32 = arith.constant 0 : i32
    %c0_i32_0 = arith.constant 0 : i32
    %c0_i32_1 = arith.constant 0 : i32
    %c0_i32_2 = arith.constant 0 : i32
    return %arg0, %c0_i32, %c0_i32_0, %c0_i32_1 : i32, i32, i32, i32
  }
  func.func @transform_1(%arg0: i32, %arg1: i32) -> (i32, i32) {
    %c0_i32 = arith.constant 0 : i32
    %c0_i32_0 = arith.constant 0 : i32
    return %c0_i32, %arg1 : i32, i32
  }
  func.func @transform_2(%arg0: i32, %arg1: i32) -> (i32, i32) {
    %c0_i32 = arith.constant 0 : i32
    %c0_i32_0 = arith.constant 0 : i32
    return %c0_i32, %arg1 : i32, i32
  }
  func.func @transform_3(%arg0: i32, %arg1: i32) -> (i32, i32) {
    %c0_i32 = arith.constant 0 : i32
    %c0_i32_0 = arith.constant 0 : i32
    return %c0_i32, %arg1 : i32, i32
  }
  func.func @transform_4(%arg0: i32, %arg1: i32) -> (i32, i32, i32, i32) {
    %c0_i32 = arith.constant 0 : i32
    %c0_i32_0 = arith.constant 0 : i32
    %c0_i32_1 = arith.constant 0 : i32
    return %arg0, %c0_i32, %c0_i32_0, %arg1 : i32, i32, i32, i32
  }
}

</mosaic_0001>

<bundles_post_ra>
// kernel: tpu_custom_call.1
= control target key start
LH: loop header
LB: loop body
LE: loop exit
PB: predicated region body
PF: predicated region fallthrough
CT: control target
= control target key end

     0   :  { %9 = vsyncpa [#allocation3], 0  ;;  %s3350_s0 = inlined_call_operand.vmem [shape: bf16[2,18,18,4], index: 0, kind: input, shape index: {}]   ;;  %s3351_s1 = inlined_call_operand.vmem [shape: bf16[36,128], index: 1, kind: input, shape index: {}]   ;;  %s3352_s2 = inlined_call_operand.vmem [shape: f32[1,128], index: 2, kind: input, shape index: {}]   ;;  %s3353_s3 = inlined_call_operand.vmem [shape: f32[1,128], index: 3, kind: input, shape index: {}]   ;;  %s3354_s4 = inlined_call_operand.hbm [shape: f32[2,16,16,128], index: 4, kind: output, shape index: {}]  }
   0x1   :  { %11 = vsyncpa [#allocation3 + $0x1], 0  ;;  %s2442_s15 = smov 0   ;;  %s2444_s16 = smov 0  }
   0x2   :  { %s2446_s17 = smov 0   ;;  %s2448_s18 = smov 0  }
   0x3   :  { %s2450_s19 = smov 0   ;;  %s2452_s20 = smov 0  }
   0x4 LB: > { %s1924_s21 = sadd.s32 4294967295, %s2405_s20   ;;  %s1925_s22 = sadd.s32 4294967294, %s2405_s20   ;;  %s2405_s20 = sphi %s2452_s20, %s17_s20   ;;  %s2401_s19 = sphi %s2450_s19, %s3361_s19   ;;  %s2397_s18 = sphi %s2448_s18, %s3360_s18   ;;  %s2393_s17 = sphi %s2446_s17, %s3359_s17   ;;  %s2389_s16 = sphi %s2444_s16, %s3358_s16   ;;  %s2385_s15 = sphi %s2442_s15, %s3357_s15  }
   0x5   : > { %s29_s23 = sadd.s32 1, %s2401_s19  ;;  %s142_s24 = sadd.s32 1, %s2393_s17 }
   0x6   : > { %p31_p0 = scmp.ge.s32.totalorder %s29_s23, 2  ;;  %p152_p1 = scmp.ne.s32.totalorder %s2393_s17, %s2389_s16 }
   0x7   : > { %p153_p2 = scmp.eq.s32.totalorder %s1924_s21, 1  ;;  %p158_p3 = scmp.ne.s32.totalorder %s2389_s16, %s2385_s15 }
   0x8   : > { %s3363_s23 = smov (%p31_p0, %s29_s23), 0  ;;  %p159_p5 = scmp.eq.s32.totalorder %s1925_s22, 1 }
   0x9   : > { %p2482_p4 = por %p153_p2, %p152_p1  ;;  %s137_s26 = ssub.s32 %s2401_s19, %s3363_s23 }
   0xa   : > { %p1931_p6 = scmp.ge.s32.totalorder %s2405_s20, 1  ;;  %p140_p7 = scmp.eq.s32.totalorder %s137_s26, 0 }
   0xb   : > { %p2489_p8 = por %p159_p5, %p158_p3  ;;  %p204_p9 = scmp.lt.s32.totalorder %s2405_s20, 3 }
   0xc   : > { %s2495_s28 = scalar_select %p140_p7, %s2393_s17, %s142_s24  }
   0xd   : > { %p205_p10 = pnand %p1931_p6, %p204_p9 }
   0xe   : > { %p240_p11 = scmp.lt.s32.totalorder (!%p205_p10), %s2397_s18, 1  ;;  %vm663_vm0 = vcmask (!%p205_p10), 1046528   ;;  %s2407_s8 = smov (!%p205_p10), 12   ;;  %vm438_vm1 = vsmask.f32 (!%p205_p10), 7424  ;;  %vm1299_vm2 = vcmask (!%p205_p10), 1041408  }
   0xf   : > { %208 = sbr.rel (%p205_p10) target bundleno = 662 (0x296), region = 36  ;;  %s2408_s9 = smov (!%p205_p10), 8   ;;  %vm982_vm3 = vcmask (!%p205_p10), 31744   ;;  %vm1015_vm4 = vcmask (!%p205_p10), 64512   ;;  %vm1081_vm5 = vcmask (!%p205_p10), 130048   ;;  %vm1048_vm6 = vcmask (!%p205_p10), 97280  }
  0x10   : > { %s2409_s10 = smov (!%p205_p10), 4   ;;  %s2410_s11 = smov (!%p205_p10), 16   ;;  %vm1114_vm7 = vcmask (!%p205_p10), 162816   ;;  %vm1147_vm8 = vcmask (!%p205_p10), 195584   ;;  %vm1180_vm9 = vcmask (!%p205_p10), 228352   ;;  %vm1213_vm10 = vcmask (!%p205_p10), 261120  }
  0x11   : > { %s2411_s12 = smov (!%p205_p10), 20   ;;  %s2412_s13 = smov (!%p205_p10), 24   ;;  %vm1266_vm11 = vcmask (!%p205_p10), 293888  }
  0x12   : > { %s2413_s26 = smov (!%p205_p10), 28   ;;  %s2414_s5 = smov (!%p205_p10), 32  }
  0x13   : > { %s2028_s14 = sshll.u32 (!%p205_p10), %s2397_s18, 12 }
  0x16   : > { %s241_s29 = scalar_select %p240_p11, %s2397_s18, 1 }
  0x18   : > { %s2094_s30 = smul.u32 216, %s241_s29 }
  0x1a   : > { %s2502_s7 = scalar_lea.vmem %s3350_s0, %s2094_s30  ;;  %s2415_s30 = smov [#allocation2]  }
  0x1b   : > { %v2505_v0 = vld [vmem:[%s2502_s7 + $0x6c] sm:$0xff]   ;;  %v2515_v2 = vld [vmem:[%s2502_s7 + $0x60] sm:$0xff]   ;;  %v2162_v3 = vld [vmem:[%s2502_s7 + $0x68] ss:$0 sps:$4 sm:$0x11]  }
  0x1c   : > { %v2508_v1 = vld [vmem:[%s2502_s7 + $0xc] sm:$0xff]   ;;  %765 = vrot.lane.b32.xlu1 %v2505_v0, %s2407_s8  ;;  %v2519_v4 = vld [vmem:[%s2502_s7] sm:$0xff]   ;;  %v691_v5 = vrot.slane %v2505_v0, 1  ;;  %v688_v6 = vrot.slane %v2515_v2, 1  ;;  %v689_v7 = vrot.slane %v2162_v3, 1  ;;  %v548_v26 = vshrl.u32 %v2505_v0, 16 }
  0x1d   : > { %749 = vrot.lane.b32.xlu0 %v2508_v1, %s2407_s8  ;;  %v2164_v8 = vld [vmem:[%s2502_s7 + $0x8] ss:$0 sps:$4 sm:$0x11]   ;;  %v667_v9 = vrot.slane %v2508_v1, 1  ;;  %v664_v10 = vrot.slane %v2519_v4, 1  ;;  %v452_v16 = vshrl.u32 %v2508_v1, 16 }
  0x1e   : > { %v2165_v11 = vld [vmem:[%s2502_s7 + $0x74] ss:$0 sps:$4 sm:$0x11]   ;;  %v2528_v12 = vsel %vm663_vm0, %v688_v6, %v689_v7  ;;  %v665_v13 = vrot.slane %v2164_v8, 1  ;;  %v454_v17 = vshll.u32 %v2508_v1, 16  ;;  %v440_v18 = vshrl.u32 %v2519_v4, 16 }
  0x1f   : > { %v2166_v14 = vld [vmem:[%s2502_s7 + $0x14] ss:$0 sps:$4 sm:$0x11]   ;;  %v692_v15 = vrot.slane %v2165_v11, 1  ;;  %v442_v22 = vshll.u32 %v2519_v4, 16  ;;  %v447_v25 = vshll.u32 %v2164_v8, 16 }
  0x20   : > { %728 = vrot.lane.b32.xlu1 %v2528_v12, %s2408_s9  ;;  %v666_v19 = vsel %vm663_vm0, %v664_v10, %v665_v13  ;;  %v668_v20 = vrot.slane %v2166_v14, 1  ;;  %v459_v21 = vshll.u32 %v2166_v14, 16  ;;  %v456_v24 = vrot.slane %v454_v17, 1  ;;  %v2550_v39 = vld [vmem:[%s2502_s7 + $0x78] sm:$0xff]   ;;  %v2598_v10 = vld [vmem:[%s2502_s7 + $0x84] sm:$0xff]  }
  0x21   : > { %712 = vrot.lane.b32.xlu0 %v666_v19, %s2408_s9  ;;  %v2540_v23 = vsel %vm663_vm0, %v691_v5, %v692_v15  ;;  %v444_v29 = vrot.slane %v442_v22, 1  ;;  %v550_v30 = vshll.u32 %v2505_v0, 16  ;;  %v449_v32 = vrot.slane %v447_v25, 1  ;;  %v2556_v46 = vld [vmem:[%s2502_s7 + $0x18] sm:$0xff]   ;;  %v2608_v14 = vld [vmem:[%s2502_s7 + $0x24] sm:$0xff]  }
  0x22   : > { %v669_v27 = vsel %vm663_vm0, %v667_v9, %v668_v20  ;;  %v461_v28 = vrot.slane %v459_v21, 1  ;;  %v457_v31 = vor.u32 %v456_v24, %v452_v16  ;;  %v555_v33 = vshll.u32 %v2165_v11, 16  ;;  %v2169_v47 = vld [vmem:[%s2502_s7 + $0x80] ss:$0 sps:$4 sm:$0x11]  }
  0x23   : > { %v536_v34 = vshrl.u32 %v2515_v2, 16  ;;  %v445_v35 = vor.u32 %v444_v29, %v440_v18  ;;  %v552_v36 = vrot.slane %v550_v30, 1  ;;  %v538_v37 = vshll.u32 %v2515_v2, 16  ;;  %v2170_v52 = vld [vmem:[%s2502_s7 + $0x20] ss:$0 sps:$4 sm:$0x11]  }
  0x24   : > { %730 = vrot.lane.b32.xlu1 %v2540_v23, %s2408_s9  ;;  %v543_v38 = vshll.u32 %v2162_v3, 16  ;;  %v462_v40 = vsel %vm438_vm1, %v457_v31, %v461_v28  ;;  %v557_v41 = vrot.slane %v555_v33, 1  ;;  %v562_v50 = vshll.u32 %v2550_v39, 16  ;;  %v2173_v15 = vld [vmem:[%s2502_s7 + $0x8c] ss:$0 sps:$4 sm:$0x11]  }
  0x25   : > { %714 = vrot.lane.b32.xlu0 %v669_v27, %s2408_s9  ;;  %v450_v42 = vsel %vm438_vm1, %v445_v35, %v449_v32  ;;  %v553_v43 = vor.u32 %v552_v36, %v548_v26  ;;  %v540_v44 = vrot.slane %v538_v37, 1  ;;  %v466_v53 = vshll.u32 %v2556_v46, 16  ;;  %v2174_v18 = vld [vmem:[%s2502_s7 + $0x2c] ss:$0 sps:$4 sm:$0x11]   ;;  %v2187_v22 = vld [vmem:[%s3351_s1] sm:$0xff]  }
  0x26   : > { %v545_v45 = vrot.slane %v543_v38, 1  ;;  %v560_v54 = vshrl.u32 %v2550_v39, 16  ;;  %v564_v55 = vrot.slane %v562_v50, 1  ;;  %v567_v56 = vshll.u32 %v2169_v47, 16  ;;  %2048 = vmatprep.subr.bf16.mxu0 %v2187_v22  ;;  %2086 = vmatprep.subr.bf16.mxu1 %v2187_v22 }
  0x27   : > { %v2561_v48 = vsel %vm438_vm1, %v553_v43, %v557_v41  ;;  %v541_v49 = vor.u32 %v540_v44, %v536_v34  ;;  %v464_v57 = vshrl.u32 %v2556_v46, 16  ;;  %v468_v58 = vrot.slane %v466_v53, 1  ;;  %2049 = vmatpush3.bf16.msra.mxu0 %v2187_v22  ;;  %2089 = vmatpush3.bf16.msra.mxu1 %v2187_v22  ;;  %v2191_v32 = vld [vmem:[%s3351_s1 + $0x10] ss:$0 sps:$4 sm:$0x33]  }
  0x28   : > { %633 = vrot.lane.b32.xlu1 %v462_v40, %s2409_s10  ;;  %v471_v59 = vshll.u32 %v2170_v52, 16  ;;  %v565_v60 = vor.u32 %v564_v55, %v560_v54  ;;  %v569_v61 = vrot.slane %v567_v56, 1  ;;  %v694_v6 = vrot.slane %v2550_v39, 1  ;;  %v2664_v43 = vld [vmem:[%s2502_s7 + $0x90] sm:$0xff]  }
  0x29   : > { %631 = vrot.lane.b32.xlu0 %v450_v42, %s2409_s10  ;;  %v2566_v51 = vsel %vm438_vm1, %v541_v49, %v545_v45  ;;  %v469_v62 = vor.u32 %v468_v58, %v464_v57  ;;  %v695_v7 = vrot.slane %v2169_v47, 1  ;;  %v670_v8 = vrot.slane %v2556_v46, 1  ;;  %v2669_v44 = vld [vmem:[%s2502_s7 + $0x30] sm:$0xff]   ;;  %v2177_v45 = vld [vmem:[%s2502_s7 + $0x98] ss:$0 sps:$4 sm:$0x11]  }
  0x2a   : > { %v473_v63 = vrot.slane %v471_v59, 1  ;;  %v2583_v3 = vsel %vm438_vm1, %v565_v60, %v569_v61  ;;  %v671_v9 = vrot.slane %v2170_v52, 1  ;;  %v574_v16 = vshll.u32 %v2598_v10, 16  ;;  %v2178_v49 = vld [vmem:[%s2502_s7 + $0x38] ss:$0 sps:$4 sm:$0x11]  }
  0x2b   : > { %v2601_v11 = vsel %vm663_vm0, %v694_v6, %v695_v7  ;;  %v572_v17 = vshrl.u32 %v2598_v10, 16  ;;  %v579_v19 = vshll.u32 %v2173_v15, 16  ;;  %v478_v20 = vshll.u32 %v2608_v14, 16 }
  0x2c   : > { %649 = vrot.lane.b32.xlu1 %v2561_v48, %s2409_s10  ;;  %v2587_v5 = vsel %vm438_vm1, %v469_v62, %v473_v63  ;;  %v2605_v13 = vsel %vm663_vm0, %v670_v8, %v671_v9  ;;  %v576_v21 = vrot.slane %v574_v16, 1  ;;  %v476_v24 = vshrl.u32 %v2608_v14, 16  ;;  %v2698_v9 = vld [vmem:[%s2502_s7 + $0x9c] sm:$0xff]  }
  0x2d   : > { %647 = vrot.lane.b32.xlu0 %v2566_v51, %s2409_s10  ;;  %v480_v25 = vrot.slane %v478_v20, 1  ;;  %v483_v26 = vshll.u32 %v2174_v18, 16  ;;  %v581_v29 = vrot.slane %v579_v19, 1  ;;  %v1301_v34 = vsel %vm1299_vm2, %v2191_v32, 0 }
  0x2e   : > { %v577_v28 = vor.u32 %v576_v21, %v572_v17  ;;  %v697_v36 = vrot.slane %v2598_v10, 1  ;;  %v698_v37 = vrot.slane %v2173_v15, 1  ;;  %v673_v38 = vrot.slane %v2608_v14, 1  ;;  %v2181_v15 = vld [vmem:[%s2502_s7 + $0xa4] ss:$0 sps:$4 sm:$0x11]  }
  0x2f   : > { %v481_v30 = vor.u32 %v480_v25, %v476_v24  ;;  %v485_v31 = vrot.slane %v483_v26, 1  ;;  %v586_v47 = vshll.u32 %v2664_v43, 16  ;;  %v490_v50 = vshll.u32 %v2669_v44, 16  ;;  %v2182_v17 = vld [vmem:[%s2502_s7 + $0x44] ss:$0 sps:$4 sm:$0x11]  }
  0x30   : > { %767 = vrot.lane.b32.xlu1 %v2550_v39, %s2407_s8  ;;  %v582_v33 = vsel %vm438_vm1, %v577_v28, %v581_v29  ;;  %v699_v41 = vsel %vm663_vm0, %v697_v36, %v698_v37  ;;  %v584_v52 = vshrl.u32 %v2664_v43, 16  ;;  %v591_v54 = vshll.u32 %v2177_v45, 16 }
  0x31   : > { %751 = vrot.lane.b32.xlu0 %v2556_v46, %s2407_s8  ;;  %v486_v35 = vsel %vm438_vm1, %v481_v30, %v485_v31  ;;  %v588_v53 = vrot.slane %v586_v47, 1  ;;  %v488_v55 = vshrl.u32 %v2669_v44, 16  ;;  %v492_v56 = vrot.slane %v490_v50, 1 }
  0x32   : > { %v495_v57 = vshll.u32 %v2178_v49, 16  ;;  %v593_v59 = vrot.slane %v591_v54, 1  ;;  %v676_v6 = vrot.slane %v2669_v44, 1  ;;  %v677_v7 = vrot.slane %v2178_v49, 1 }
  0x33   : > { %v589_v58 = vor.u32 %v588_v53, %v584_v52  ;;  %v493_v60 = vor.u32 %v492_v56, %v488_v55  ;;  %v598_v16 = vshll.u32 %v2698_v9, 16  ;;  %v596_v19 = vshrl.u32 %v2698_v9, 16  ;;  %v2764_v56 = vld [vmem:[%s2502_s7 + $0xa8] sm:$0xff]  }
  0x34   : > { %812 = vrot.lane.b32.xlu1 %v2561_v48, %s2410_s11  ;;  %v497_v61 = vrot.slane %v495_v57, 1  ;;  %v603_v21 = vshll.u32 %v2181_v15, 16  ;;  %v507_v25 = vshll.u32 %v2182_v17, 16  ;;  %v703_v36 = vrot.slane %v2698_v9, 1 }
  0x35   : > { %796 = vrot.lane.b32.xlu0 %v462_v40, %s2410_s11  ;;  %v674_v40 = vrot.slane %v2174_v18, 1  ;;  %v594_v62 = vsel %vm438_vm1, %v589_v58, %v593_v59  ;;  %v600_v20 = vrot.slane %v598_v16, 1  ;;  %v704_v37 = vrot.slane %v2181_v15, 1  ;;  %v2770_v58 = vld [vmem:[%s2502_s7 + $0x48] sm:$0xff]  }
  0x36   : > { %v498_v63 = vsel %vm438_vm1, %v493_v60, %v497_v61  ;;  %v509_v29 = vrot.slane %v507_v25, 1  ;;  %v2185_v60 = vld [vmem:[%s2502_s7 + $0xb0] ss:$0 sps:$4 sm:$0x11]   ;;  %v610_v61 = vshll.u32 %v2764_v56, 16  ;;  %v512_v15 = vshrl.u32 %v2770_v58, 16 }
  0x37   : > { %v675_v42 = vsel %vm663_vm0, %v673_v38, %v674_v40  ;;  %v601_v26 = vor.u32 %v600_v20, %v596_v19 }
  0x38   : > { %814 = vrot.lane.b32.xlu1 %v2583_v3, %s2410_s11 }
  0x39   : > { %798 = vrot.lane.b32.xlu0 %v2587_v5, %s2410_s11 }
  0x3c   : > { %847 = vrot.lane.b32.xlu1 %v2540_v23, %s2411_s12 }
  0x3d   : > { %831 = vrot.lane.b32.xlu0 %v669_v27, %s2411_s12  ;;  %v2188_v27 = vld [vmem:[%s3351_s1 + $0x8] sm:$0xff]  }
  0x3e   : > { %2050 = vmatprep.subr.bf16.mxu0 %v2188_v27  ;;  %2087 = vmatprep.subr.bf16.mxu1 %v2188_v27 }
  0x3f   : > { %2051 = vmatpush3.bf16.msra.mxu0 %v2188_v27  ;;  %2090 = vmatpush3.bf16.msra.mxu1 %v2188_v27  ;;  %v605_v27 = vrot.slane %v603_v21, 1 }
  0x40   : > { %849 = vrot.lane.b32.xlu1 %v2601_v11, %s2411_s12  ;;  %2092 = vmatprep.subr.msk.bf16.mxu0 %vm1299_vm2, %v2191_v32 }
  0x41   : > { %833 = vrot.lane.b32.xlu0 %v2605_v13, %s2411_s12  ;;  %2093 = vmatprep.subr.msk.bf16.mxu1 %vm1299_vm2, %v2191_v32  ;;  %v606_v31 = vsel %vm438_vm1, %v601_v26, %v605_v27 }
  0x43   : > { %2053 = vmatpush3.bf16.msra.mxu0 %v1301_v34  ;;  %2091 = vmatpush3.bf16.msra.mxu1 %v1301_v34 }
  0x44   : > { %884 = vrot.lane.b32.xlu1 %v2550_v39, %s2412_s13 }
  0x45   : > { %868 = vrot.lane.b32.xlu0 %v2556_v46, %s2412_s13 }
  0x48   : > { %886 = vrot.lane.b32.xlu1 %v2598_v10, %s2412_s13 }
  0x49   : > { %870 = vrot.lane.b32.xlu0 %v2608_v14, %s2412_s13 }
  0x4c   : > { %931 = vrot.lane.b32.xlu1 %v2583_v3, %s2413_s26 }
  0x4d   : > { %915 = vrot.lane.b32.xlu0 %v2587_v5, %s2413_s26 }
  0x50   : > { %933 = vrot.lane.b32.xlu1 %v582_v33, %s2413_s26 }
  0x51   : > { %917 = vrot.lane.b32.xlu0 %v486_v35, %s2413_s26 }
  0x54   : > { %966 = vrot.lane.b32.xlu1 %v2601_v11, %s2414_s5 }
  0x55   : > { %950 = vrot.lane.b32.xlu0 %v2605_v13, %s2414_s5 }
  0x58   : > { %651 = vrot.lane.b32.xlu1 %v2583_v3, %s2409_s10  ;;  %v700_v3 = vrot.slane %v2664_v43, 1 }
  0x59   : > { %635 = vrot.lane.b32.xlu0 %v2587_v5, %s2409_s10  ;;  %v701_v5 = vrot.slane %v2177_v45, 1  ;;  %v705_v45 = vsel %vm663_vm0, %v703_v36, %v704_v37  ;;  %v706_v36 = vrot.slane %v2764_v56, 1  ;;  %v707_v37 = vrot.slane %v2185_v60, 1 }
  0x5b   : > { %v702_v8 = vsel %vm663_vm0, %v700_v3, %v701_v5  ;;  %v514_v3 = vshll.u32 %v2770_v58, 16 }
  0x5c   : > { %968 = vrot.lane.b32.xlu1 %v699_v41, %s2414_s5 }
  0x5d   : > { %952 = vrot.lane.b32.xlu0 %v675_v42, %s2414_s5  ;;  %v516_v16 = vrot.slane %v514_v3, 1  ;;  %v2826_v3 = vld [vmem:[%s2502_s7 + $0xb4] sm:$0xff]  }
  0x60   : > { %653 = vrot.lane.b32.xlu1 %v582_v33, %s2409_s10 }
  0x61   : > { %637 = vrot.lane.b32.xlu0 %v486_v35, %s2409_s10 }
  0x64   : > { %732 = vrot.lane.b32.xlu1 %v2601_v11, %s2408_s9  ;;  %v678_v11 = vsel %vm663_vm0, %v676_v6, %v677_v7  ;;  %v608_v6 = vshrl.u32 %v2764_v56, 16  ;;  %v612_v7 = vrot.slane %v610_v61, 1 }
  0x65   : > { %716 = vrot.lane.b32.xlu0 %v2605_v13, %s2408_s9  ;;  %v2703_v13 = vld [vmem:[%s2502_s7 + $0x3c] sm:$0xff]  }
  0x66   : > { %v502_v18 = vshll.u32 %v2703_v13, 16  ;;  %v500_v22 = vshrl.u32 %v2703_v13, 16  ;;  %v679_v40 = vrot.slane %v2703_v13, 1  ;;  %v613_v19 = vor.u32 %v612_v7, %v608_v6 }
  0x68   : > { %734 = vrot.lane.b32.xlu1 %v699_v41, %s2408_s9  ;;  %v504_v24 = vrot.slane %v502_v18, 1 }
  0x69   : > { %718 = vrot.lane.b32.xlu0 %v675_v42, %s2408_s9 }
  0x6a   : > { %v505_v28 = vor.u32 %v504_v24, %v500_v22  ;;  %v517_v22 = vor.u32 %v516_v16, %v512_v15 }
  0x6c   : > { %769 = vrot.lane.b32.xlu1 %v2598_v10, %s2407_s8 }
  0x6d   : > { %753 = vrot.lane.b32.xlu0 %v2608_v14, %s2407_s8 }
  0x70   : > { %771 = vrot.lane.b32.xlu1 %v2664_v43, %s2407_s8 }
  0x71   : > { %755 = vrot.lane.b32.xlu0 %v2669_v44, %s2407_s8 }
  0x74   : > { %816 = vrot.lane.b32.xlu1 %v582_v33, %s2410_s11  ;;  %v510_v33 = vsel %vm438_vm1, %v505_v28, %v509_v29 }
  0x75   : > { %800 = vrot.lane.b32.xlu0 %v486_v35, %s2410_s11 }
  0x78   : > { %818 = vrot.lane.b32.xlu1 %v594_v62, %s2410_s11 }
  0x79   : > { %802 = vrot.lane.b32.xlu0 %v498_v63, %s2410_s11 }
  0x7c   : > { %851 = vrot.lane.b32.xlu1 %v699_v41, %s2411_s12  ;;  %v680_v41 = vrot.slane %v2182_v17, 1 }
  0x7d   : > { %835 = vrot.lane.b32.xlu0 %v675_v42, %s2411_s12 }
  0x7e   : > { %v2749_v49 = vsel %vm663_vm0, %v679_v40, %v680_v41 }
  0x80   : > { %853 = vrot.lane.b32.xlu1 %v702_v8, %s2411_s12 }
  0x81   : > { %837 = vrot.lane.b32.xlu0 %v678_v11, %s2411_s12 }
  0x84   : > { %888 = vrot.lane.b32.xlu1 %v2664_v43, %s2412_s13 }
  0x85   : > { %872 = vrot.lane.b32.xlu0 %v2669_v44, %s2412_s13 }
  0x88   : > { %890 = vrot.lane.b32.xlu1 %v2698_v9, %s2412_s13 }
  0x89   : > { %874 = vrot.lane.b32.xlu0 %v2703_v13, %s2412_s13 }
  0x8c   : > { %935 = vrot.lane.b32.xlu1 %v594_v62, %s2413_s26 }
  0x8d   : > { %919 = vrot.lane.b32.xlu0 %v498_v63, %s2413_s26 }
  0x8e   : > { %v2722_v30 = vpop.permute.xlu1 %765 }
  0x8f   : > { %v2726_v32 = vpop.permute.xlu0 %749 }
  0x90   : > { %937 = vrot.lane.b32.xlu1 %v606_v31, %s2413_s26 }
  0x91   : > { %921 = vrot.lane.b32.xlu0 %v510_v33, %s2413_s26 }
  0x92   : > { %v2731_v34 = vpop.permute.xlu1 %728 }
  0x93   : > { %v2733_v35 = vpop.permute.xlu0 %712 }
  0x94   : > { %970 = vrot.lane.b32.xlu1 %v702_v8, %s2414_s5 }
  0x95   : > { %954 = vrot.lane.b32.xlu0 %v678_v11, %s2414_s5 }
  0x96   : > { %v2738_v38 = vpop.permute.xlu1 %730 }
  0x97   : > { %v2741_v42 = vpop.permute.xlu0 %714 }
  0x98   : > { %655 = vrot.lane.b32.xlu1 %v594_v62, %s2409_s10 }
  0x99   : > { %639 = vrot.lane.b32.xlu0 %v498_v63, %s2409_s10  ;;  %v2186_v63 = vld [vmem:[%s2502_s7 + $0x50] ss:$0 sps:$4 sm:$0x11]  }
  0x9a   : > { %v2746_v47 = vpop.permute.xlu1 %633  ;;  %v519_v17 = vshll.u32 %v2186_v63, 16  ;;  %v683_v40 = vrot.slane %v2186_v63, 1 }
  0x9b   : > { %v632_v50 = vpop.permute.xlu0 %631 }
  0x9c   : > { %972 = vrot.lane.b32.xlu1 %v705_v45, %s2414_s5  ;;  %v521_v24 = vrot.slane %v519_v17, 1  ;;  %v984_v6 = vsel %vm982_vm3, %v2519_v4, %v632_v50 }
  0x9d   : > { %956 = vrot.lane.b32.xlu0 %v2749_v49, %s2414_s5  ;;  %v1017_v4 = vsel %vm1015_vm4, %v984_v6, %v2733_v35  ;;  %v2855_v35 = vld [vmem:[%s2502_s7 + $0x5c] ss:$0 sps:$4 sm:$0x11]  }
  0x9e   : > { %v2754_v52 = vpop.permute.xlu1 %649  ;;  %v2807_v28 = vsel %vm438_vm1, %v517_v22, %v521_v24  ;;  %v620_v22 = vshrl.u32 %v2826_v3, 16 }
  0x9f   : > { %v648_v53 = vpop.permute.xlu0 %647 }
  0xa0   : > { %657 = vrot.lane.b32.xlu1 %v606_v31, %s2409_s10  ;;  %v1000_v41 = vsel %vm982_vm3, %v2515_v2, %v648_v53 }
  0xa1   : > { %641 = vrot.lane.b32.xlu0 %v510_v33, %s2409_s10  ;;  %v1033_v53 = vsel %vm1015_vm4, %v1000_v41, %v2731_v34  ;;  %v622_v34 = vshll.u32 %v2826_v3, 16 }
  0xa2   : > { %v2758_v54 = vpop.permute.xlu1 %767  ;;  %v1066_v50 = vsel %vm1048_vm6, %v1033_v53, %v2722_v30  ;;  %v531_v53 = vshll.u32 %v2855_v35, 16 }
  0xa3   : > { %v2760_v55 = vpop.permute.xlu0 %751 }
  0xa4   : > { %736 = vrot.lane.b32.xlu1 %v702_v8, %s2408_s9  ;;  %v615_v8 = vshll.u32 %v2185_v60, 16  ;;  %v2823_v60 = vsel %vm663_vm0, %v706_v36, %v707_v37  ;;  %v624_v36 = vrot.slane %v622_v34, 1 }
  0xa5   : > { %720 = vrot.lane.b32.xlu0 %v678_v11, %s2408_s9 }
  0xa6   : > { %v2767_v57 = vpop.permute.xlu1 %812  ;;  %v617_v20 = vrot.slane %v615_v8, 1 }
  0xa7   : > { %v2772_v59 = vpop.permute.xlu0 %796  ;;  %v1099_v16 = vsel %vm1081_vm5, %v1066_v50, %v2767_v57 }
  0xa8   : > { %738 = vrot.lane.b32.xlu1 %v705_v45, %s2408_s9  ;;  %v2803_v26 = vsel %vm438_vm1, %v613_v19, %v617_v20  ;;  %v1050_v19 = vsel %vm1048_vm6, %v1017_v4, %v2726_v32  ;;  %v1002_v32 = vsel %vm982_vm3, %v2505_v0, %v2754_v52  ;;  %v986_v0 = vsel %vm982_vm3, %v2508_v1, %v2746_v47 }
  0xa9   : > { %722 = vrot.lane.b32.xlu0 %v2749_v49, %s2408_s9  ;;  %v1083_v57 = vsel %vm1081_vm5, %v1050_v19, %v2772_v59  ;;  %v625_v4 = vor.u32 %v624_v36, %v620_v22  ;;  %v1019_v47 = vsel %vm1015_vm4, %v986_v0, %v2741_v42 }
  0xaa   : > { %v2779_v62 = vpop.permute.xlu1 %814 }
  0xab   : > { %v2783_v5 = vpop.permute.xlu0 %798 }
  0xac   : > { %773 = vrot.lane.b32.xlu1 %v2698_v9, %s2407_s8 }
  0xad   : > { %757 = vrot.lane.b32.xlu0 %v2703_v13, %s2407_s8 }
  0xae   : > { %v848_v11 = vpop.permute.xlu1 %847 }
  0xaf   : > { %v2791_v18 = vpop.permute.xlu0 %831  ;;  %v1132_v20 = vsel %vm1114_vm7, %v1099_v16, %v848_v11  ;;  %v533_v16 = vrot.slane %v531_v53, 1  ;;  %v2194_v53 = vld [vmem:[%s2502_s7 + $0xc0] sm:$0xff]  }
  0xb0   : > { %775 = vrot.lane.b32.xlu1 %v2764_v56, %s2407_s8  ;;  %v1116_v11 = vsel %vm1114_vm7, %v1083_v57, %v2791_v18 }
  0xb1   : > { %759 = vrot.lane.b32.xlu0 %v2770_v58, %s2407_s8 }
  0xb2   : > { %v2797_v21 = vpop.permute.xlu1 %849 }
  0xb3   : > { %v2799_v25 = vpop.permute.xlu0 %833 }
  0xb4   : > { %820 = vrot.lane.b32.xlu1 %v606_v31, %s2410_s11 }
  0xb5   : > { %804 = vrot.lane.b32.xlu0 %v510_v33, %s2410_s11  ;;  %v682_v33 = vrot.slane %v2770_v58, 1 }
  0xb6   : > { %v885_v27 = vpop.permute.xlu1 %884 }
  0xb7   : > { %v869_v29 = vpop.permute.xlu0 %868  ;;  %v2835_v7 = vsel %vm663_vm0, %v682_v33, %v683_v40  ;;  %v1165_v24 = vsel %vm1147_vm8, %v1132_v20, %v885_v27 }
  0xb8   : > { %822 = vrot.lane.b32.xlu1 %v2803_v26, %s2410_s11  ;;  %v1149_v27 = vsel %vm1147_vm8, %v1116_v11, %v869_v29  ;;  %v1035_v29 = vsel %vm1015_vm4, %v1002_v32, %v2738_v38 }
  0xb9   : > { %806 = vrot.lane.b32.xlu0 %v2807_v28, %s2410_s11  ;;  %v1068_v50 = vsel %vm1048_vm6, %v1035_v29, %v2758_v54  ;;  %v787_v29 = vshll.u32 %v2194_v53, 16 }
  0xba   : > { %v2814_v31 = vpop.permute.xlu1 %886  ;;  %v1101_v38 = vsel %vm1081_vm5, %v1068_v50, %v2779_v62 }
  0xbb   : > { %v2819_v61 = vpop.permute.xlu0 %870  ;;  %v1134_v54 = vsel %vm1114_vm7, %v1101_v38, %v2797_v21 }
  0xbc   : > { %855 = vrot.lane.b32.xlu1 %v705_v45, %s2411_s12  ;;  %v2838_v45 = vld [vmem:[%s2502_s7 + $0x54] sm:$0xff]   ;;  %v1167_v42 = vsel %vm1147_vm8, %v1134_v54, %v2814_v31 }
  0xbd   : > { %839 = vrot.lane.b32.xlu0 %v2749_v49, %s2411_s12  ;;  %v2845_v49 = vld [vmem:[%s2502_s7 + $0xbc] ss:$0 sps:$4 sm:$0x11]   ;;  %v526_v17 = vshll.u32 %v2838_v45, 16  ;;  %v524_v59 = vshrl.u32 %v2838_v45, 16  ;;  %v685_v11 = vrot.slane %v2838_v45, 1 }
  0xbe   : > { %v932_v63 = vpop.permute.xlu1 %931  ;;  %v627_v37 = vshll.u32 %v2845_v49, 16 }
  0xbf   : > { %v916_v8 = vpop.permute.xlu0 %915  ;;  %v1198_v33 = vsel %vm1180_vm9, %v1165_v24, %v932_v63  ;;  %v528_v6 = vrot.slane %v526_v17, 1  ;;  %v1052_v17 = vsel %vm1048_vm6, %v1019_v47, %v2760_v55 }
  0xc0   : > { %857 = vrot.lane.b32.xlu1 %v2823_v60, %s2411_s12  ;;  %v1182_v52 = vsel %vm1180_vm9, %v1149_v27, %v916_v8  ;;  %v629_v34 = vrot.slane %v627_v37, 1  ;;  %v1085_v20 = vsel %vm1081_vm5, %v1052_v17, %v2783_v5  ;;  %v710_v37 = vrot.slane %v2845_v49, 1 }
  0xc1   : > { %841 = vrot.lane.b32.xlu0 %v2835_v7, %s2411_s12  ;;  %v529_v8 = vor.u32 %v528_v6, %v524_v59  ;;  %v1118_v22 = vsel %vm1114_vm7, %v1085_v20, %v2799_v25 }
  0xc2   : > { %v934_v15 = vpop.permute.xlu1 %933  ;;  %v630_v62 = vsel %vm438_vm1, %v625_v4, %v629_v34  ;;  %v1151_v57 = vsel %vm1147_vm8, %v1118_v22, %v2819_v61  ;;  %v789_v34 = vrot.slane %v787_v29, 1  ;;  %v828_v22 = vrot.slane %v2194_v53, 1 }
  0xc3   : > { %v918_v30 = vpop.permute.xlu0 %917  ;;  %v1200_v55 = vsel %vm1180_vm9, %v1167_v42, %v934_v15  ;;  %v534_v5 = vsel %vm438_vm1, %v529_v8, %v533_v16 }
  0xc4   : > { %892 = vrot.lane.b32.xlu1 %v2764_v56, %s2412_s13  ;;  %v1184_v31 = vsel %vm1180_vm9, %v1151_v57, %v918_v30  ;;  %v709_v30 = vrot.slane %v2826_v3, 1 }
  0xc5   : > { %876 = vrot.lane.b32.xlu0 %v2770_v58, %s2412_s13 }
  0xc6   : > { %v967_v40 = vpop.permute.xlu1 %966  ;;  %v711_v59 = vsel %vm663_vm0, %v709_v30, %v710_v37  ;;  %v3005_v30 = vld [vmem:[%s2502_s7 + $0xd4] ss:$0 sps:$4 sm:$0x11]  }
  0xc7   : > { %v1231_v41 = vsel %vm1213_vm10, %v1198_v33, %v967_v40  ;;  %v951_v18 = vpop.permute.xlu0 %950  ;;  %v686_v33 = vrot.slane %v2855_v35, 1 }
  0xc8   : > { %894 = vrot.lane.b32.xlu1 %v2826_v3, %s2412_s13  ;;  %2070 = vmatprep.mubr.msk.bf16.mxu1 %vm1266_vm11, %v1231_v41  ;;  %v1215_v63 = vsel %vm1213_vm10, %v1182_v52, %v951_v18  ;;  %v2195_v18 = vld [vmem:[%s2502_s7 + $0xc8] ss:$0 sps:$4 sm:$0x11]  }
  0xc9   : > { %878 = vrot.lane.b32.xlu0 %v2838_v45, %s2412_s13  ;;  %2054 = vmatprep.mubr.msk.bf16.mxu0 %vm1266_vm11, %v1215_v63  ;;  %v687_v27 = vsel %vm663_vm0, %v685_v11, %v686_v33  ;;  %v792_v50 = vshll.u32 %v2195_v18, 16 }
  0xca   : > { %v2895_v1 = vpop.permute.xlu1 %651 }
  0xcb   : > { %v2905_v19 = vpop.permute.xlu0 %635  ;;  %v794_v8 = vrot.slane %v792_v50, 1 }
  0xcc   : > { %939 = vrot.lane.b32.xlu1 %v2803_v26, %s2413_s26  ;;  %v988_v11 = vsel %vm982_vm3, %v2556_v46, %v2905_v19 }
  0xcd   : > { %923 = vrot.lane.b32.xlu0 %v2807_v28, %s2413_s26 }
  0xce   : > { %v969_v21 = vpop.permute.xlu1 %968 }
  0xcf   : > { %v1233_v24 = vsel %vm1213_vm10, %v1200_v55, %v969_v21  ;;  %v953_v36 = vpop.permute.xlu0 %952  ;;  %v829_v55 = vrot.slane %v2195_v18, 1 }
  0xd0   : > { %941 = vrot.lane.b32.xlu1 %v630_v62, %s2413_s26  ;;  %2071 = vmatmul.mubr.msk.bf16.vlgmr.msra.gmra.mrb[0].mxu1 %vm1266_vm11, %v1233_v24  ;;  %v1217_v25 = vsel %vm1213_vm10, %v1184_v31, %v953_v36  ;;  %v2995_v24 = vld [vmem:[%s2502_s7 + $0xcc] sm:$0xff]   ;;  %v1004_v31 = vsel %vm982_vm3, %v2550_v39, %v2895_v1 }
  0xd1   : > { %925 = vrot.lane.b32.xlu0 %v534_v5, %s2413_s26  ;;  %2055 = vmatmul.mubr.msk.bf16.vlgmr.msra.gmra.mrb[0].mxu0 %vm1266_vm11, %v1217_v25  ;;  %v906_v37 = vshll.u32 %v2995_v24, 16  ;;  %v904_v46 = vshrl.u32 %v2995_v24, 16 }
  0xd2   : > { %v2929_v15 = vpop.permute.xlu1 %653 }
  0xd3   : > { %v2931_v61 = vpop.permute.xlu0 %637  ;;  %v908_v29 = vrot.slane %v906_v37, 1 }
  0xd4   : > { %974 = vrot.lane.b32.xlu1 %v2823_v60, %s2414_s5 }
  0xd5   : > { %958 = vrot.lane.b32.xlu0 %v2835_v7, %s2414_s5 }
  0xd6   : > { %v733_v32 = vpop.permute.xlu1 %732 }
  0xd7   : > { %v2941_v40 = vpop.permute.xlu0 %716  ;;  %v1037_v25 = vsel %vm1015_vm4, %v1004_v31, %v733_v32 }
  0xd8   : > { %659 = vrot.lane.b32.xlu1 %v2803_v26, %s2409_s10  ;;  %v1021_v1 = vsel %vm1015_vm4, %v988_v11, %v2941_v40 }
  0xd9   : > { %643 = vrot.lane.b32.xlu0 %v2807_v28, %s2409_s10 }
  0xda   : > { %v2948_v49 = vpop.permute.xlu1 %734 }
  0xdb   : > { %v2951_v41 = vpop.permute.xlu0 %718 }
  0xdc   : > { %976 = vrot.lane.b32.xlu1 %v711_v59, %s2414_s5 }
  0xdd   : > { %960 = vrot.lane.b32.xlu0 %v687_v27, %s2414_s5 }
  0xde   : > { %v770_v35 = vpop.permute.xlu1 %769 }
  0xdf   : > { %v754_v6 = vpop.permute.xlu0 %753  ;;  %v1070_v33 = vsel %vm1048_vm6, %v1037_v25, %v770_v35  ;;  %v948_v25 = vrot.slane %v3005_v30, 1 }
  0xe0   : > { %661 = vrot.lane.b32.xlu1 %v630_v62, %s2409_s10  ;;  %v1054_v32 = vsel %vm1048_vm6, %v1021_v1, %v754_v6 }
  0xe1   : > { %645 = vrot.lane.b32.xlu0 %v534_v5, %s2409_s10 }
  0xe2   : > { %v2957_v26 = vpop.permute.xlu1 %771 }
  0xe3   : > { %v2959_v28 = vpop.permute.xlu0 %755 }
  0xe4   : > { %740 = vrot.lane.b32.xlu1 %v2823_v60, %s2408_s9  ;;  %v785_v60 = vshrl.u32 %v2194_v53, 16 }
  0xe5   : > { %724 = vrot.lane.b32.xlu0 %v2835_v7, %s2408_s9 }
  0xe6   : > { %v817_v0 = vpop.permute.xlu1 %816  ;;  %v790_v38 = vor.u32 %v789_v34, %v785_v60  ;;  %v911_v60 = vshll.u32 %v3005_v30, 16 }
  0xe7   : > { %v801_v52 = vpop.permute.xlu0 %800 }
  0xe8   : > { %742 = vrot.lane.b32.xlu1 %v711_v59, %s2408_s9  ;;  %v795_v54 = vsel %vm438_vm1, %v790_v38, %v794_v8  ;;  %v1087_v19 = vsel %vm1081_vm5, %v1054_v32, %v801_v52  ;;  %v1006_v52 = vsel %vm982_vm3, %v2598_v10, %v2929_v15  ;;  %v909_v38 = vor.u32 %v908_v29, %v904_v46  ;;  %v2326_v15 = vld [vmem:[%s2502_s7 + $0x6c] sm:$0xff]  }
  0xe9   : > { %726 = vrot.lane.b32.xlu0 %v687_v27, %s2408_s9  ;;  %v913_v8 = vrot.slane %v911_v60, 1 }
  0xea   : > { %v2969_v63 = vpop.permute.xlu1 %818 }
  0xeb   : > { %v2971_v4 = vpop.permute.xlu0 %802  ;;  %v914_v31 = vsel %vm438_vm1, %v909_v38, %v913_v8 }
  0xec   : > { %777 = vrot.lane.b32.xlu1 %v2826_v3, %s2407_s8 }
  0xed   : > { %761 = vrot.lane.b32.xlu0 %v2838_v45, %s2407_s8 }
  0xee   : > { %v852_v7 = vpop.permute.xlu1 %851 }
  0xef   : > { %v836_v47 = vpop.permute.xlu0 %835 }
  0xf0   : > { %779 = vrot.lane.b32.xlu1 %v2194_v53, %s2407_s8  ;;  %v1120_v40 = vsel %vm1114_vm7, %v1087_v19, %v836_v47 }
  0xf1   : > { %763 = vrot.lane.b32.xlu0 %v2515_v2, %s2407_s8 }
  0xf2   : > { %v2980_v16 = vpop.permute.xlu1 %853 }
  0xf3   : > { %v2982_v17 = vpop.permute.xlu0 %837 }
  0xf4   : > { %824 = vrot.lane.b32.xlu1 %v630_v62, %s2410_s11  ;;  %v2992_v62 = vsel %vm663_vm0, %v828_v22, %v829_v55 }
  0xf5   : > { %808 = vrot.lane.b32.xlu0 %v534_v5, %s2410_s11 }
  0xf6   : > { %v889_v20 = vpop.permute.xlu1 %888 }
  0xf7   : > { %v873_v42 = vpop.permute.xlu0 %872 }
  0xf8   : > { %826 = vrot.lane.b32.xlu1 %v795_v54, %s2410_s11 }
  0xf9   : > { %810 = vrot.lane.b32.xlu0 %v2566_v51, %s2410_s11  ;;  %s237_s11 = sand.u32 1, %s2389_s16  }
  0xfa   : > { %v891_v21 = vpop.permute.xlu1 %890  ;;  %s3303_s18 = scalar_lea.sflag [#allocation3], %s237_s11 }
  0xfb   : > { %v875_v57 = vpop.permute.xlu0 %874 }
  0xfc   : > { %859 = vrot.lane.b32.xlu1 %v711_v59, %s2411_s12  ;;  %v1103_v59 = vsel %vm1081_vm5, %v1070_v33, %v817_v0 }
  0xfd   : > { %843 = vrot.lane.b32.xlu0 %v687_v27, %s2411_s12  ;;  %v1136_v27 = vsel %vm1114_vm7, %v1103_v59, %v852_v7 }
  0xfe   : > { %v936_v5 = vpop.permute.xlu1 %935  ;;  %v1169_v35 = vsel %vm1147_vm8, %v1136_v27, %v889_v20  ;;  %v990_v20 = vsel %vm982_vm3, %v2608_v14, %v2931_v61 }
  0xff   : > { %v920_v36 = vpop.permute.xlu0 %919  ;;  %v1202_v0 = vsel %vm1180_vm9, %v1169_v35, %v936_v5 }
 0x100   : > { %861 = vrot.lane.b32.xlu1 %v2992_v62, %s2411_s12 }
 0x101   : > { %845 = vrot.lane.b32.xlu0 %v2528_v12, %s2411_s12  ;;  %s1932_s12 = sshll.u32 %s237_s11, 8 }
 0x102   : > { %v938_v39 = vpop.permute.xlu1 %937 }
 0x103   : > { %v922_v18 = vpop.permute.xlu0 %921 }
 0x104   : > { %896 = vrot.lane.b32.xlu1 %v2194_v53, %s2412_s13  ;;  %v1153_v53 = vsel %vm1147_vm8, %v1120_v40, %v873_v42 }
 0x105   : > { %880 = vrot.lane.b32.xlu0 %v2515_v2, %s2412_s13  ;;  %v1186_v50 = vsel %vm1180_vm9, %v1153_v53, %v920_v36  ;;  %v1039_v2 = vsel %vm1015_vm4, %v1006_v52, %v2948_v49  ;;  %v1023_v49 = vsel %vm1015_vm4, %v990_v20, %v2951_v41 }
 0x106   : > { %v971_v6 = vpop.permute.xlu1 %970  ;;  %v1072_v10 = vsel %vm1048_vm6, %v1039_v2, %v2957_v26  ;;  %v1056_v55 = vsel %vm1048_vm6, %v1023_v49, %v2959_v28 }
 0x107   : > { %v1235_v34 = vsel %vm1213_vm10, %v1202_v0, %v971_v6  ;;  %v955_v7 = vpop.permute.xlu0 %954  ;;  %v1105_v22 = vsel %vm1081_vm5, %v1072_v10, %v2969_v63  ;;  %v1089_v26 = vsel %vm1081_vm5, %v1056_v55, %v2971_v4 }
 0x108   : > { %898 = vrot.lane.b32.xlu1 %v2995_v24, %s2412_s13  ;;  %2074 = vmatprep.mubr.msk.bf16.mxu1 %vm1266_vm11, %v1235_v34  ;;  %v1219_v47 = vsel %vm1213_vm10, %v1186_v50, %v955_v7  ;;  %v1138_v14 = vsel %vm1114_vm7, %v1105_v22, %v2980_v16  ;;  %v1122_v41 = vsel %vm1114_vm7, %v1089_v26, %v2982_v17  ;;  %v947_v17 = vrot.slane %v2995_v24, 1 }
 0x109   : > { %882 = vrot.lane.b32.xlu0 %v2326_v15, %s2412_s13  ;;  %2058 = vmatprep.mubr.msk.bf16.mxu0 %vm1266_vm11, %v1219_v47  ;;  %v1171_v5 = vsel %vm1147_vm8, %v1138_v14, %v891_v21  ;;  %v1155_v16 = vsel %vm1147_vm8, %v1122_v41, %v875_v57  ;;  %s3200_s13 = scalar_lea.vmem [#allocation2], %s1932_s12 }
 0x10a   : > { %v656_v42 = vpop.permute.xlu1 %655  ;;  %v1204_v63 = vsel %vm1180_vm9, %v1171_v5, %v938_v39  ;;  %v1188_v36 = vsel %vm1180_vm9, %v1155_v16, %v922_v18  ;;  %v949_v37 = vsel %vm663_vm0, %v947_v17, %v948_v25  ;;  %s1813_s21 = sshll.u32 %s3200_s13, 4  ;;  %s3297_s21 = int_to_ptr.vmem [resolvable:$true] %s1813_s21 }
 0x10b   : > { %v640_v61 = vpop.permute.xlu0 %639  ;;  %s2327_s29 = scalar_lea.vmem %s3297_s21, 4096 }
 0x10c   : > { %943 = vrot.lane.b32.xlu1 %v795_v54, %s2413_s26  ;;  %v992_v52 = vsel %vm982_vm3, %v2669_v44, %v640_v61  ;;  %p2328_p12 = scmp.ne.s32.totalorder %s3297_s21, %s2327_s29 }
 0x10d   : > { %927 = vrot.lane.b32.xlu0 %v2566_v51, %s2413_s26 }
 0x10e   : > { %v973_v28 = vpop.permute.xlu1 %972  ;;  %p2329_p13 = pnand %p2328_p12, %p2482_p4 }
 0x10f   : > { %v1237_v54 = vsel %vm1213_vm10, %v1204_v63, %v973_v28  ;;  %v957_v4 = vpop.permute.xlu0 %956 }
 0x110   : > { %945 = vrot.lane.b32.xlu1 %v914_v31, %s2413_s26  ;;  %2075 = vmatmul.mubr.msk.bf16.gmra.mrb[4].mxu1 %vm1266_vm11, %v1237_v54  ;;  %v1221_v21 = vsel %vm1213_vm10, %v1188_v36, %v957_v4  ;;  %p2330_p0 = pneg %p2329_p13 }
 0x111   : > { %929 = vrot.lane.b32.xlu0 %v2561_v48, %s2413_s26  ;;  %2059 = vmatmul.mubr.msk.bf16.gmra.mrb[4].mxu0 %vm1266_vm11, %v1221_v21  ;;  %s3293_s26 = scalar_lea.hbm %s3354_s4, %s2028_s14 }
 0x112   : > { %v658_v51 = vpop.permute.xlu1 %657 }
 0x113   : > { %v642_v57 = vpop.permute.xlu0 %641  ;;  %v1010_v55 = vsel %vm982_vm3, %v2698_v9, %v658_v51 }
 0x114   : > { %978 = vrot.lane.b32.xlu1 %v2992_v62, %s2414_s5  ;;  %v994_v31 = vsel %vm982_vm3, %v2703_v13, %v642_v57 }
 0x115   : > { %962 = vrot.lane.b32.xlu0 %v2528_v12, %s2414_s5 }
 0x116   : > { %v737_v11 = vpop.permute.xlu1 %736 }
 0x117   : > { %v721_v33 = vpop.permute.xlu0 %720 }
 0x118   : > { %980 = vrot.lane.b32.xlu1 %v949_v37, %s2414_s5  ;;  %v1025_v2 = vsel %vm1015_vm4, %v992_v52, %v721_v33 }
 0x119   : > { %964 = vrot.lane.b32.xlu0 %v2540_v23, %s2414_s5  ;;  %v1008_v23 = vsel %vm982_vm3, %v2664_v43, %v656_v42  ;;  %s2331_s5 = sshll.u32 %s2415_s30, 4  ;;  %s2332_s5 = int_to_ptr.vmem [resolvable:$false] %s2331_s5 }
 0x11a   : > { %v739_v48 = vpop.permute.xlu1 %738  ;;  %v1041_v34 = vsel %vm1015_vm4, %v1008_v23, %v737_v11  ;;  %s2333_s6 = scalar_lea.vmem %s2332_s5, 8192  ;;  %p2334_p1 = scmp.lt.s32.totalorder %s3297_s21, %s2332_s5 }
 0x11b   : > { %v723_v24 = vpop.permute.xlu0 %722  ;;  %v1043_v26 = vsel %vm1015_vm4, %v1010_v55, %v739_v48  ;;  %p2335_p2 = scmp.lt.s32.totalorder %s2333_s6, %s2327_s29 }
 0x11c   : > { %v1027_v28 = vsel %vm1015_vm4, %v994_v31, %v723_v24 }
 0x11d   : > { %p2336_p3 = por %p2335_p2, %p2334_p1 }
 0x11e   : > { %v774_v30 = vpop.permute.xlu1 %773 }
 0x11f   : > { %v758_v39 = vpop.permute.xlu0 %757  ;;  %v1074_v50 = vsel %vm1048_vm6, %v1041_v34, %v774_v30  ;;  %p2337_p5 = pnand %p2336_p3, %p2330_p0 }
 0x120   : > { %v1058_v38 = vsel %vm1048_vm6, %v1025_v2, %v758_v39 }
 0x122   : > { %v776_v1 = vpop.permute.xlu1 %775 }
 0x123   : > { %v760_v59 = vpop.permute.xlu0 %759  ;;  %v1076_v41 = vsel %vm1048_vm6, %v1043_v26, %v776_v1 }
 0x124   : > { %v1060_v16 = vsel %vm1048_vm6, %v1027_v28, %v760_v59 }
 0x126   : > { %v821_v32 = vpop.permute.xlu1 %820 }
 0x127   : > { %v805_v62 = vpop.permute.xlu0 %804  ;;  %v1107_v47 = vsel %vm1081_vm5, %v1074_v50, %v821_v32 }
 0x128   : > { %v1091_v43 = vsel %vm1081_vm5, %v1058_v38, %v805_v62 }
 0x12a   : > { %v823_v27 = vpop.permute.xlu1 %822 }
 0x12b   : > { %v807_v18 = vpop.permute.xlu0 %806  ;;  %v1109_v9 = vsel %vm1081_vm5, %v1076_v41, %v823_v27 }
 0x12c   : > { %v1093_v4 = vsel %vm1081_vm5, %v1060_v16, %v807_v18 }
 0x12e   : > { %v856_v46 = vpop.permute.xlu1 %855 }
 0x12f   : > { %v840_v19 = vpop.permute.xlu0 %839  ;;  %v1140_v8 = vsel %vm1114_vm7, %v1107_v47, %v856_v46 }
 0x130   : > { %v1124_v15 = vsel %vm1114_vm7, %v1091_v43, %v840_v19 }
 0x132   : > { %v858_v12 = vpop.permute.xlu1 %857 }
 0x133   : > { %v842_v35 = vpop.permute.xlu0 %841  ;;  %v1142_v54 = vsel %vm1114_vm7, %v1109_v9, %v858_v12 }
 0x134   : > { %v1126_v13 = vsel %vm1114_vm7, %v1093_v4, %v842_v35 }
 0x136   : > { %v893_v29 = vpop.permute.xlu1 %892 }
 0x137   : > { %v877_v60 = vpop.permute.xlu0 %876  ;;  %v1173_v10 = vsel %vm1147_vm8, %v1140_v8, %v893_v29 }
 0x138   : > { %v1157_v49 = vsel %vm1147_vm8, %v1124_v15, %v877_v60 }
 0x13a   : > { %v895_v40 = vpop.permute.xlu1 %894 }
 0x13b   : > { %v879_v0 = vpop.permute.xlu0 %878  ;;  %v1175_v21 = vsel %vm1147_vm8, %v1142_v54, %v895_v40 }
 0x13c   : > { %v1159_v51 = vsel %vm1147_vm8, %v1126_v13, %v879_v0 }
 0x13e   : > { %v940_v6 = vpop.permute.xlu1 %939 }
 0x13f   : > { %v924_v53 = vpop.permute.xlu0 %923  ;;  %v1206_v44 = vsel %vm1180_vm9, %v1173_v10, %v940_v6 }
 0x140   : > { %v1190_v14 = vsel %vm1180_vm9, %v1157_v49, %v924_v53 }
 0x142   : > { %v942_v7 = vpop.permute.xlu1 %941 }
 0x143   : > { %v926_v20 = vpop.permute.xlu0 %925  ;;  %v1208_v17 = vsel %vm1180_vm9, %v1175_v21, %v942_v7 }
 0x144   : > { %v1192_v37 = vsel %vm1180_vm9, %v1159_v51, %v926_v20 }
 0x146   : > { %v975_v42 = vpop.permute.xlu1 %974 }
 0x147   : > { %v1239_v22 = vsel %vm1213_vm10, %v1206_v44, %v975_v42  ;;  %v959_v61 = vpop.permute.xlu0 %958 }
 0x148   : > { %2078 = vmatprep.mubr.msk.bf16.mxu1 %vm1266_vm11, %v1239_v22  ;;  %v1223_v5 = vsel %vm1213_vm10, %v1190_v14, %v959_v61 }
 0x149   : > { %2062 = vmatprep.mubr.msk.bf16.mxu0 %vm1266_vm11, %v1223_v5 }
 0x14a   : > { %v660_v63 = vpop.permute.xlu1 %659 }
 0x14b   : > { %v644_v36 = vpop.permute.xlu0 %643  ;;  %v1012_v50 = vsel %vm982_vm3, %v2764_v56, %v660_v63 }
 0x14c   : > { %v996_v47 = vsel %vm982_vm3, %v2770_v58, %v644_v36 }
 0x14e   : > { %v977_v25 = vpop.permute.xlu1 %976 }
 0x14f   : > { %v1241_v57 = vsel %vm1213_vm10, %v1208_v17, %v977_v25  ;;  %v961_v11 = vpop.permute.xlu0 %960 }
 0x150   : > { %2079 = vmatmul.mubr.msk.bf16.gmra.mrb[8].mxu1 %vm1266_vm11, %v1241_v57  ;;  %v1225_v33 = vsel %vm1213_vm10, %v1192_v37, %v961_v11  ;;  %v3168_v11 = vld [vmem:[%s3352_s2] ss:$0 sm:$0xff] }
 0x151   : > { %2063 = vmatmul.mubr.msk.bf16.gmra.mrb[8].mxu0 %vm1266_vm11, %v1225_v33  ;;  %v3173_v33 = vld [vmem:[%s3353_s3] ss:$0 sm:$0xff] }
 0x152   : > { %v662_v48 = vpop.permute.xlu1 %661 }
 0x153   : > { %v646_v24 = vpop.permute.xlu0 %645  ;;  %v1014_v10 = vsel %vm982_vm3, %v2826_v3, %v662_v48 }
 0x154   : > { %v998_v22 = vsel %vm982_vm3, %v2838_v45, %v646_v24 }
 0x156   : > { %v741_v30 = vpop.permute.xlu1 %740 }
 0x157   : > { %v725_v39 = vpop.permute.xlu0 %724  ;;  %v1045_v2 = vsel %vm1015_vm4, %v1012_v50, %v741_v30 }
 0x158   : > { %v1029_v20 = vsel %vm1015_vm4, %v996_v47, %v725_v39 }
 0x15a   : > { %v743_v1 = vpop.permute.xlu1 %742 }
 0x15b   : > { %v727_v59 = vpop.permute.xlu0 %726  ;;  %v1047_v42 = vsel %vm1015_vm4, %v1014_v10, %v743_v1 }
 0x15c   : > { %v1031_v26 = vsel %vm1015_vm4, %v998_v22, %v727_v59 }
 0x15e   : > { %v778_v32 = vpop.permute.xlu1 %777 }
 0x15f   : > { %v762_v62 = vpop.permute.xlu0 %761  ;;  %v1078_v38 = vsel %vm1048_vm6, %v1045_v2, %v778_v32 }
 0x160   : > { %v1062_v15 = vsel %vm1048_vm6, %v1029_v20, %v762_v62 }
 0x162   : > { %v780_v27 = vpop.permute.xlu1 %779 }
 0x163   : > { %v764_v18 = vpop.permute.xlu0 %763  ;;  %v1080_v55 = vsel %vm1048_vm6, %v1047_v42, %v780_v27 }
 0x164   : > { %v1064_v63 = vsel %vm1048_vm6, %v1031_v26, %v764_v18 }
 0x166   : > { %v825_v46 = vpop.permute.xlu1 %824 }
 0x167   : > { %v809_v19 = vpop.permute.xlu0 %808  ;;  %v1111_v43 = vsel %vm1081_vm5, %v1078_v38, %v825_v46 }
 0x168   : > { %v1095_v49 = vsel %vm1081_vm5, %v1062_v15, %v809_v19 }
 0x16a   : > { %v827_v12 = vpop.permute.xlu1 %826 }
 0x16b   : > { %v811_v35 = vpop.permute.xlu0 %810  ;;  %v1113_v5 = vsel %vm1081_vm5, %v1080_v55, %v827_v12 }
 0x16c   : > { %v1097_v16 = vsel %vm1081_vm5, %v1064_v63, %v811_v35 }
 0x16e   : > { %v860_v29 = vpop.permute.xlu1 %859 }
 0x16f   : > { %v844_v60 = vpop.permute.xlu0 %843  ;;  %v1144_v56 = vsel %vm1114_vm7, %v1111_v43, %v860_v29 }
 0x170   : > { %v1128_v14 = vsel %vm1114_vm7, %v1095_v49, %v844_v60 }
 0x172   : > { %v862_v40 = vpop.permute.xlu1 %861 }
 0x173   : > { %v846_v0 = vpop.permute.xlu0 %845  ;;  %v1146_v28 = vsel %vm1114_vm7, %v1113_v5, %v862_v40 }
 0x174   : > { %v1130_v4 = vsel %vm1114_vm7, %v1097_v16, %v846_v0 }
 0x176   : > { %v897_v6 = vpop.permute.xlu1 %896 }
 0x177   : > { %v881_v23 = vpop.permute.xlu0 %880  ;;  %v1177_v58 = vsel %vm1147_vm8, %v1144_v56, %v897_v6 }
 0x178   : > { %v1161_v31 = vsel %vm1147_vm8, %v1128_v14, %v881_v23 }
 0x17a   : > { %v899_v53 = vpop.permute.xlu1 %898 }
 0x17b   : > { %v883_v34 = vpop.permute.xlu0 %882  ;;  %v1179_v54 = vsel %vm1147_vm8, %v1146_v28, %v899_v53 }
 0x17c   : > { %v1163_v17 = vsel %vm1147_vm8, %v1130_v4, %v883_v34 }
 0x17e   : > { %v944_v52 = vpop.permute.xlu1 %943 }
 0x17f   : > { %v928_v7 = vpop.permute.xlu0 %927  ;;  %v1210_v3 = vsel %vm1180_vm9, %v1177_v58, %v944_v52 }
 0x180   : > { %v1194_v45 = vsel %vm1180_vm9, %v1161_v31, %v928_v7 }
 0x182   : > { %v946_v8 = vpop.permute.xlu1 %945 }
 0x183   : > { %v930_v44 = vpop.permute.xlu0 %929  ;;  %v1212_v21 = vsel %vm1180_vm9, %v1179_v54, %v946_v8 }
 0x184   : > { %v1196_v51 = vsel %vm1180_vm9, %v1163_v17, %v930_v44 }
 0x186   : > { %v979_v61 = vpop.permute.xlu1 %978 }
 0x187   : > { %v1243_v41 = vsel %vm1213_vm10, %v1210_v3, %v979_v61  ;;  %v963_v9 = vpop.permute.xlu0 %962 }
 0x188   : > { %2082 = vmatprep.mubr.msk.bf16.mxu1 %vm1266_vm11, %v1243_v41  ;;  %v1227_v36 = vsel %vm1213_vm10, %v1194_v45, %v963_v9 }
 0x189   : > { %2066 = vmatprep.mubr.msk.bf16.mxu0 %vm1266_vm11, %v1227_v36 }
 0x18a   : > { %v981_v13 = vpop.permute.xlu1 %980 }
 0x18b   : > { %v1245_v25 = vsel %vm1213_vm10, %v1212_v21, %v981_v13  ;;  %v965_v57 = vpop.permute.xlu0 %964 }
 0x18c   : > { %2083 = vmatmul.mubr.msk.bf16.gmra.mrb[12].mxu1 %vm1266_vm11, %v1245_v25  ;;  %v1229_v37 = vsel %vm1213_vm10, %v1196_v51, %v965_v57 }
 0x18d   : > { %2067 = vmatmul.mubr.msk.bf16.gmra.mrb[12].mxu0 %vm1266_vm11, %v1229_v37 }
 0x1a3   : > { %v2072_v48 = vpop.f32.mrb[0].mxu1 }
 0x1a4   : > { %v1489_v24 = vmul.f32 %v2072_v48, %v3168_v11  ;;  %v1401_v30 = vpop.f32.mrb[1].mxu1  ;;  %v2056_v39 = vpop.f32.mrb[0].mxu0 }
 0x1a5   : > { %v1487_v1 = vmul.f32 %v3168_v11, %v1401_v30  ;;  %v2073_v59 = vpop.f32.mrb[2].mxu1  ;;  %v1473_v32 = vmul.f32 %v2056_v39, %v3168_v11  ;;  %v1337_v27 = vpop.f32.mrb[1].mxu0 }
 0x1a6   : > { %v1528_v62 = vadd.f32 %v3173_v33, %v1489_v24  ;;  %v1490_v18 = vmul.f32 %v2073_v59, %v3168_v11  ;;  %v1404_v46 = vpop.f32.mrb[3].mxu1  ;;  %v1471_v19 = vmul.f32 %v3168_v11, %v1337_v27  ;;  %v2057_v35 = vpop.f32.mrb[2].mxu0 }
 0x1a7   : > { %v1526_v12 = vadd.f32 %v3173_v33, %v1487_v1  ;;  %v1488_v29 = vmul.f32 %v3168_v11, %v1404_v46  ;;  %v1512_v60 = vadd.f32 %v3173_v33, %v1473_v32  ;;  %v1474_v0 = vmul.f32 %v2057_v35, %v3168_v11  ;;  %v1340_v23 = vpop.f32.mrb[3].mxu0 }
 0x1a8   : > { %v2009_v40 = vmul.f32 -1.442695, %v1528_v62  ;;  %v3186_v6 = vadd.f32 %v3173_v33, %v1490_v18  ;;  %v1510_v53 = vadd.f32 %v3173_v33, %v1471_v19  ;;  %v1472_v52 = vmul.f32 %v3168_v11, %v1340_v23 }
 0x1a9   : > { %v2007_v34 = vmul.f32 -1.442695, %v1526_v12  ;;  %v3191_v50 = vadd.f32 %v3173_v33, %v1488_v29  ;;  %v1993_v7 = vmul.f32 -1.442695, %v1512_v60  ;;  %v1513_v2 = vadd.f32 %v3173_v33, %v1474_v0 }
 0x1aa   : > { %2198 = vpow2.f32 %v2009_v40  ;;  %v1991_v47 = vmul.f32 -1.442695, %v1510_v53  ;;  %v2010_v38 = vmul.f32 -1.442695, %v3186_v6  ;;  %v1511_v8 = vadd.f32 %v3173_v33, %v1472_v52 }
 0x1ab   : > { %2200 = vpow2.f32 %v2007_v34  ;;  %v1994_v20 = vmul.f32 -1.442695, %v1513_v2  ;;  %v2008_v10 = vmul.f32 -1.442695, %v3191_v50 }
 0x1ac   : > { %2202 = vpow2.f32 %v1993_v7  ;;  %v1992_v43 = vmul.f32 -1.442695, %v1511_v8 }
 0x1ad   : > { %2204 = vpow2.f32 %v1991_v47 }
 0x1ae   : > { %2206 = vpow2.f32 %v1994_v20 }
 0x1af   : > { %2208 = vpow2.f32 %v2010_v38 }
 0x1b0   : > { %2210 = vpow2.f32 %v1992_v43 }
 0x1b1   : > { %2212 = vpow2.f32 %v2008_v10 }
 0x1b4   : > { %v2199_v15 = vpop.eup %2198 }
 0x1b5   : > { %v2201_v56 = vpop.eup %2200  ;;  %v1656_v44 = vadd.f32 1.0, %v2199_v15 }
 0x1b6   : > { %v2203_v42 = vpop.eup %2202  ;;  %v1654_v49 = vadd.f32 1.0, %v2201_v56 }
 0x1b7   : > { %v2205_v58 = vpop.eup %2204  ;;  %v1640_v22 = vadd.f32 1.0, %v2203_v42  ;;  %2214 = vrcp.f32 %v1656_v44 }
 0x1b8   : > { %v2207_v55 = vpop.eup %2206  ;;  %v1638_v14 = vadd.f32 1.0, %v2205_v58  ;;  %2216 = vrcp.f32 %v1654_v49 }
 0x1b9   : > { %v2209_v3 = vpop.eup %2208  ;;  %2218 = vrcp.f32 %v1640_v22  ;;  %v1641_v61 = vadd.f32 1.0, %v2207_v55 }
 0x1ba   : > { %v2211_v26 = vpop.eup %2210  ;;  %2220 = vrcp.f32 %v1638_v14  ;;  %v1657_v5 = vadd.f32 1.0, %v2209_v3 }
 0x1bb   : > { %v2213_v31 = vpop.eup %2212  ;;  %2222 = vrcp.f32 %v1641_v61  ;;  %v1639_v41 = vadd.f32 1.0, %v2211_v26 }
 0x1bc   : > { %2224 = vrcp.f32 %v1657_v5  ;;  %v1655_v63 = vadd.f32 1.0, %v2213_v31 }
 0x1bd   : > { %2226 = vrcp.f32 %v1639_v41 }
 0x1be   : > { %2228 = vrcp.f32 %v1655_v63 }
 0x1c1   : > { %v2215_v28 = vpop.eup %2214 }
 0x1c2   : > { %v2217_v45 = vpop.eup %2216  ;;  %v1752_v9 = vmul.f32 %v2215_v28, %v1528_v62 }
 0x1c3   : > { %v2219_v16 = vpop.eup %2218  ;;  %v1750_v54 = vmul.f32 %v2217_v45, %v1526_v12 }
 0x1c4   : > { %v2221_v36 = vpop.eup %2220  ;;  %v1736_v4 = vmul.f32 %v2219_v16, %v1512_v60  ;;  %1784 = vst [vmem:[%s3200_s13 + $0x90] sm:$0xff] %v1752_v9 }
 0x1c5   : > { %v2223_v21 = vpop.eup %2222  ;;  %v1734_v13 = vmul.f32 %v2221_v36, %v1510_v53  ;;  %1782 = vst [vmem:[%s3200_s13 + $0x80] sm:$0xff] %v1750_v54 }
 0x1c6   : > { %v2225_v17 = vpop.eup %2224  ;;  %1768 = vst [vmem:[%s3200_s13 + $0x10] sm:$0xff] %v1736_v4  ;;  %v1737_v25 = vmul.f32 %v2223_v21, %v1513_v2 }
 0x1c7   : > { %v2227_v51 = vpop.eup %2226  ;;  %1766 = vst [vmem:[%s3200_s13] sm:$0xff] %v1734_v13  ;;  %v1753_v57 = vmul.f32 %v2225_v17, %v3186_v6 }
 0x1c8   : > { %v2229_v37 = vpop.eup %2228  ;;  %1769 = vst [vmem:[%s3200_s13 + $0x18] sm:$0xff] %v1737_v25  ;;  %v1735_v48 = vmul.f32 %v2227_v51, %v1511_v8 }
 0x1c9   : > { %1785 = vst [vmem:[%s3200_s13 + $0x98] sm:$0xff] %v1753_v57  ;;  %v1751_v24 = vmul.f32 %v2229_v37, %v3191_v50 }
 0x1ca   : > { %1767 = vst [vmem:[%s3200_s13 + $0x8] sm:$0xff] %v1735_v48 }
 0x1cb   : > { %1783 = vst [vmem:[%s3200_s13 + $0x88] sm:$0xff] %v1751_v24 }
 0x1e3   : > { %v2076_v30 = vpop.f32.mrb[4].mxu1 }
 0x1e4   : > { %v1493_v39 = vmul.f32 %v2076_v30, %v3168_v11  ;;  %v1417_v1 = vpop.f32.mrb[5].mxu1  ;;  %v2060_v59 = vpop.f32.mrb[4].mxu0 }
 0x1e5   : > { %v1491_v32 = vmul.f32 %v3168_v11, %v1417_v1  ;;  %v2077_v62 = vpop.f32.mrb[6].mxu1  ;;  %v1477_v27 = vmul.f32 %v2060_v59, %v3168_v11  ;;  %v1353_v46 = vpop.f32.mrb[5].mxu0 }
 0x1e6   : > { %v1532_v18 = vadd.f32 %v3173_v33, %v1493_v39  ;;  %v1494_v19 = vmul.f32 %v2077_v62, %v3168_v11  ;;  %v1420_v12 = vpop.f32.mrb[7].mxu1  ;;  %v1475_v35 = vmul.f32 %v3168_v11, %v1353_v46  ;;  %v2061_v60 = vpop.f32.mrb[6].mxu0 }
 0x1e7   : > { %v1530_v29 = vadd.f32 %v3173_v33, %v1491_v32  ;;  %v1492_v40 = vmul.f32 %v3168_v11, %v1420_v12  ;;  %v1516_v0 = vadd.f32 %v3173_v33, %v1477_v27  ;;  %v1478_v23 = vmul.f32 %v2061_v60, %v3168_v11  ;;  %v1356_v34 = vpop.f32.mrb[7].mxu0 }
 0x1e8   : > { %v2013_v6 = vmul.f32 -1.442695, %v1532_v18  ;;  %v1533_v53 = vadd.f32 %v3173_v33, %v1494_v19  ;;  %v1514_v52 = vadd.f32 %v3173_v33, %v1475_v35  ;;  %v1476_v7 = vmul.f32 %v3168_v11, %v1356_v34 }
 0x1e9   : > { %v2011_v50 = vmul.f32 -1.442695, %v1530_v29  ;;  %v1531_v2 = vadd.f32 %v3173_v33, %v1492_v40  ;;  %v1997_v47 = vmul.f32 -1.442695, %v1516_v0  ;;  %v1517_v38 = vadd.f32 %v3173_v33, %v1478_v23 }
 0x1ea   : > { %2230 = vpow2.f32 %v2013_v6  ;;  %v1995_v8 = vmul.f32 -1.442695, %v1514_v52  ;;  %v2014_v20 = vmul.f32 -1.442695, %v1533_v53  ;;  %v1515_v43 = vadd.f32 %v3173_v33, %v1476_v7 }
 0x1eb   : > { %2232 = vpow2.f32 %v2011_v50  ;;  %v1998_v10 = vmul.f32 -1.442695, %v1517_v38  ;;  %v2012_v56 = vmul.f32 -1.442695, %v1531_v2 }
 0x1ec   : > { %2234 = vpow2.f32 %v1997_v47  ;;  %v1996_v15 = vmul.f32 -1.442695, %v1515_v43 }
 0x1ed   : > { %2236 = vpow2.f32 %v1995_v8 }
 0x1ee   : > { %2238 = vpow2.f32 %v1998_v10 }
 0x1ef   : > { %2240 = vpow2.f32 %v2014_v20 }
 0x1f0   : > { %2242 = vpow2.f32 %v1996_v15 }
 0x1f1   : > { %2244 = vpow2.f32 %v2012_v56 }
 0x1f4   : > { %v2231_v44 = vpop.eup %2230 }
 0x1f5   : > { %v2233_v42 = vpop.eup %2232  ;;  %v1660_v49 = vadd.f32 1.0, %v2231_v44 }
 0x1f6   : > { %v2235_v58 = vpop.eup %2234  ;;  %v1658_v22 = vadd.f32 1.0, %v2233_v42 }
 0x1f7   : > { %v2237_v55 = vpop.eup %2236  ;;  %v1644_v14 = vadd.f32 1.0, %v2235_v58  ;;  %2246 = vrcp.f32 %v1660_v49 }
 0x1f8   : > { %v2239_v3 = vpop.eup %2238  ;;  %v1642_v61 = vadd.f32 1.0, %v2237_v55  ;;  %2248 = vrcp.f32 %v1658_v22 }
 0x1f9   : > { %v2241_v26 = vpop.eup %2240  ;;  %2250 = vrcp.f32 %v1644_v14  ;;  %v1645_v5 = vadd.f32 1.0, %v2239_v3 }
 0x1fa   : > { %v2243_v31 = vpop.eup %2242  ;;  %2252 = vrcp.f32 %v1642_v61  ;;  %v1661_v41 = vadd.f32 1.0, %v2241_v26 }
 0x1fb   : > { %v2245_v63 = vpop.eup %2244  ;;  %2254 = vrcp.f32 %v1645_v5  ;;  %v1643_v28 = vadd.f32 1.0, %v2243_v31 }
 0x1fc   : > { %2256 = vrcp.f32 %v1661_v41  ;;  %v1659_v45 = vadd.f32 1.0, %v2245_v63 }
 0x1fd   : > { %2258 = vrcp.f32 %v1643_v28 }
 0x1fe   : > { %2260 = vrcp.f32 %v1659_v45 }
 0x201   : > { %v2247_v9 = vpop.eup %2246 }
 0x202   : > { %v2249_v16 = vpop.eup %2248  ;;  %v1756_v54 = vmul.f32 %v2247_v9, %v1532_v18 }
 0x203   : > { %v2251_v36 = vpop.eup %2250  ;;  %v1754_v4 = vmul.f32 %v2249_v16, %v1530_v29 }
 0x204   : > { %v2253_v21 = vpop.eup %2252  ;;  %v1740_v13 = vmul.f32 %v2251_v36, %v1516_v0  ;;  %1788 = vst [vmem:[%s3200_s13 + $0xb0] sm:$0xff] %v1756_v54 }
 0x205   : > { %v2255_v17 = vpop.eup %2254  ;;  %v1738_v25 = vmul.f32 %v2253_v21, %v1514_v52  ;;  %1786 = vst [vmem:[%s3200_s13 + $0xa0] sm:$0xff] %v1754_v4 }
 0x206   : > { %v2257_v51 = vpop.eup %2256  ;;  %1772 = vst [vmem:[%s3200_s13 + $0x30] sm:$0xff] %v1740_v13  ;;  %v1741_v57 = vmul.f32 %v2255_v17, %v1517_v38 }
 0x207   : > { %v2259_v37 = vpop.eup %2258  ;;  %1770 = vst [vmem:[%s3200_s13 + $0x20] sm:$0xff] %v1738_v25  ;;  %v1757_v48 = vmul.f32 %v2257_v51, %v1533_v53 }
 0x208   : > { %v2261_v24 = vpop.eup %2260  ;;  %1773 = vst [vmem:[%s3200_s13 + $0x38] sm:$0xff] %v1741_v57  ;;  %v1739_v30 = vmul.f32 %v2259_v37, %v1515_v43 }
 0x209   : > { %1789 = vst [vmem:[%s3200_s13 + $0xb8] sm:$0xff] %v1757_v48  ;;  %v1755_v39 = vmul.f32 %v2261_v24, %v1531_v2 }
 0x20a   : > { %1771 = vst [vmem:[%s3200_s13 + $0x28] sm:$0xff] %v1739_v30 }
 0x20b   : > { %1787 = vst [vmem:[%s3200_s13 + $0xa8] sm:$0xff] %v1755_v39 }
 0x223   : > { %v2080_v1 = vpop.f32.mrb[8].mxu1 }
 0x224   : > { %v1497_v59 = vmul.f32 %v2080_v1, %v3168_v11  ;;  %v1433_v32 = vpop.f32.mrb[9].mxu1  ;;  %v2064_v62 = vpop.f32.mrb[8].mxu0 }
 0x225   : > { %v1495_v27 = vmul.f32 %v3168_v11, %v1433_v32  ;;  %v2081_v18 = vpop.f32.mrb[10].mxu1  ;;  %v1481_v46 = vmul.f32 %v2064_v62, %v3168_v11  ;;  %v1369_v12 = vpop.f32.mrb[9].mxu0 }
 0x226   : > { %v1536_v19 = vadd.f32 %v3173_v33, %v1497_v59  ;;  %v1498_v35 = vmul.f32 %v2081_v18, %v3168_v11  ;;  %v1436_v29 = vpop.f32.mrb[11].mxu1  ;;  %v1479_v60 = vmul.f32 %v3168_v11, %v1369_v12  ;;  %v2065_v0 = vpop.f32.mrb[10].mxu0 }
 0x227   : > { %v1534_v40 = vadd.f32 %v3173_v33, %v1495_v27  ;;  %v1496_v6 = vmul.f32 %v3168_v11, %v1436_v29  ;;  %v1520_v23 = vadd.f32 %v3173_v33, %v1481_v46  ;;  %v1482_v34 = vmul.f32 %v2065_v0, %v3168_v11  ;;  %v1372_v50 = vpop.f32.mrb[11].mxu0 }
 0x228   : > { %v2017_v53 = vmul.f32 -1.442695, %v1536_v19  ;;  %v1537_v52 = vadd.f32 %v3173_v33, %v1498_v35  ;;  %v1518_v7 = vadd.f32 %v3173_v33, %v1479_v60  ;;  %v1480_v47 = vmul.f32 %v3168_v11, %v1372_v50 }
 0x229   : > { %v2015_v2 = vmul.f32 -1.442695, %v1534_v40  ;;  %v1535_v38 = vadd.f32 %v3173_v33, %v1496_v6  ;;  %v2001_v8 = vmul.f32 -1.442695, %v1520_v23  ;;  %v1521_v20 = vadd.f32 %v3173_v33, %v1482_v34 }
 0x22a   : > { %2262 = vpow2.f32 %v2017_v53  ;;  %v1999_v43 = vmul.f32 -1.442695, %v1518_v7  ;;  %v2018_v10 = vmul.f32 -1.442695, %v1537_v52  ;;  %v1519_v15 = vadd.f32 %v3173_v33, %v1480_v47 }
 0x22b   : > { %2264 = vpow2.f32 %v2015_v2  ;;  %v2002_v56 = vmul.f32 -1.442695, %v1521_v20  ;;  %v2016_v42 = vmul.f32 -1.442695, %v1535_v38 }
 0x22c   : > { %2266 = vpow2.f32 %v2001_v8  ;;  %v2000_v44 = vmul.f32 -1.442695, %v1519_v15 }
 0x22d   : > { %2268 = vpow2.f32 %v1999_v43 }
 0x22e   : > { %2270 = vpow2.f32 %v2002_v56 }
 0x22f   : > { %2272 = vpow2.f32 %v2018_v10 }
 0x230   : > { %2274 = vpow2.f32 %v2000_v44 }
 0x231   : > { %2276 = vpow2.f32 %v2016_v42 }
 0x234   : > { %v2263_v49 = vpop.eup %2262 }
 0x235   : > { %v2265_v58 = vpop.eup %2264  ;;  %v1664_v22 = vadd.f32 1.0, %v2263_v49 }
 0x236   : > { %v2267_v55 = vpop.eup %2266  ;;  %v1662_v14 = vadd.f32 1.0, %v2265_v58 }
 0x237   : > { %v2269_v3 = vpop.eup %2268  ;;  %v1648_v61 = vadd.f32 1.0, %v2267_v55  ;;  %2278 = vrcp.f32 %v1664_v22 }
 0x238   : > { %v2271_v26 = vpop.eup %2270  ;;  %v1646_v5 = vadd.f32 1.0, %v2269_v3  ;;  %2280 = vrcp.f32 %v1662_v14 }
 0x239   : > { %v2273_v31 = vpop.eup %2272  ;;  %2282 = vrcp.f32 %v1648_v61  ;;  %v1649_v41 = vadd.f32 1.0, %v2271_v26 }
 0x23a   : > { %v2275_v63 = vpop.eup %2274  ;;  %2284 = vrcp.f32 %v1646_v5  ;;  %v1665_v28 = vadd.f32 1.0, %v2273_v31 }
 0x23b   : > { %v2277_v45 = vpop.eup %2276  ;;  %2286 = vrcp.f32 %v1649_v41  ;;  %v1647_v9 = vadd.f32 1.0, %v2275_v63 }
 0x23c   : > { %2288 = vrcp.f32 %v1665_v28  ;;  %v1663_v16 = vadd.f32 1.0, %v2277_v45 }
 0x23d   : > { %2290 = vrcp.f32 %v1647_v9 }
 0x23e   : > { %2292 = vrcp.f32 %v1663_v16 }
 0x241   : > { %v2279_v54 = vpop.eup %2278 }
 0x242   : > { %v2281_v36 = vpop.eup %2280  ;;  %v1760_v4 = vmul.f32 %v2279_v54, %v1536_v19 }
 0x243   : > { %v2283_v21 = vpop.eup %2282  ;;  %v1758_v13 = vmul.f32 %v2281_v36, %v1534_v40 }
 0x244   : > { %v2285_v17 = vpop.eup %2284  ;;  %v1744_v25 = vmul.f32 %v2283_v21, %v1520_v23  ;;  %1792 = vst [vmem:[%s3200_s13 + $0xd0] sm:$0xff] %v1760_v4 }
 0x245   : > { %v2287_v51 = vpop.eup %2286  ;;  %v1742_v57 = vmul.f32 %v2285_v17, %v1518_v7  ;;  %1790 = vst [vmem:[%s3200_s13 + $0xc0] sm:$0xff] %v1758_v13 }
 0x246   : > { %v2289_v37 = vpop.eup %2288  ;;  %1776 = vst [vmem:[%s3200_s13 + $0x50] sm:$0xff] %v1744_v25  ;;  %v1745_v48 = vmul.f32 %v2287_v51, %v1521_v20 }
 0x247   : > { %v2291_v24 = vpop.eup %2290  ;;  %1774 = vst [vmem:[%s3200_s13 + $0x40] sm:$0xff] %v1742_v57  ;;  %v1761_v30 = vmul.f32 %v2289_v37, %v1537_v52 }
 0x248   : > { %v2293_v39 = vpop.eup %2292  ;;  %1777 = vst [vmem:[%s3200_s13 + $0x58] sm:$0xff] %v1745_v48  ;;  %v1743_v1 = vmul.f32 %v2291_v24, %v1519_v15 }
 0x249   : > { %1793 = vst [vmem:[%s3200_s13 + $0xd8] sm:$0xff] %v1761_v30  ;;  %v1759_v59 = vmul.f32 %v2293_v39, %v1535_v38 }
 0x24a   : > { %1775 = vst [vmem:[%s3200_s13 + $0x48] sm:$0xff] %v1743_v1 }
 0x24b   : > { %1791 = vst [vmem:[%s3200_s13 + $0xc8] sm:$0xff] %v1759_v59 }
 0x25f   : > { %v2084_v32 = vpop.f32.mrb[12].mxu1 }
 0x260   : > { %v1501_v62 = vmul.f32 %v2084_v32, %v3168_v11  ;;  %v1449_v27 = vpop.f32.mrb[13].mxu1  ;;  %v2068_v18 = vpop.f32.mrb[12].mxu0 }
 0x261   : > { %v1499_v46 = vmul.f32 %v3168_v11, %v1449_v27  ;;  %v2085_v19 = vpop.f32.mrb[14].mxu1  ;;  %v1485_v12 = vmul.f32 %v2068_v18, %v3168_v11  ;;  %v1385_v29 = vpop.f32.mrb[13].mxu0 }
 0x262   : > { %v1540_v35 = vadd.f32 %v3173_v33, %v1501_v62  ;;  %v1502_v60 = vmul.f32 %v2085_v19, %v3168_v11  ;;  %v1452_v40 = vpop.f32.mrb[15].mxu1  ;;  %v1483_v0 = vmul.f32 %v3168_v11, %v1385_v29  ;;  %v2069_v23 = vpop.f32.mrb[14].mxu0 }
 0x263   : > { %v1538_v6 = vadd.f32 %v3173_v33, %v1499_v46  ;;  %v1500_v53 = vmul.f32 %v3168_v11, %v1452_v40  ;;  %v1524_v34 = vadd.f32 %v3173_v33, %v1485_v12  ;;  %v1486_v50 = vmul.f32 %v2069_v23, %v3168_v11  ;;  %v1388_v2 = vpop.f32.mrb[15].mxu0 }
 0x264   : > { %v2021_v52 = vmul.f32 -1.442695, %v1540_v35  ;;  %v3271_v7 = vadd.f32 %v3173_v33, %v1502_v60  ;;  %v1522_v47 = vadd.f32 %v3173_v33, %v1483_v0  ;;  %v1484_v8 = vmul.f32 %v3168_v11, %v1388_v2 }
 0x265   : > { %v2019_v38 = vmul.f32 -1.442695, %v1538_v6  ;;  %v3276_v20 = vadd.f32 %v3173_v33, %v1500_v53  ;;  %v2005_v43 = vmul.f32 -1.442695, %v1524_v34  ;;  %v1525_v10 = vadd.f32 %v3173_v33, %v1486_v50 }
 0x266   : > { %2294 = vpow2.f32 %v2021_v52  ;;  %v2003_v15 = vmul.f32 -1.442695, %v1522_v47  ;;  %v2022_v56 = vmul.f32 -1.442695, %v3271_v7  ;;  %v1523_v44 = vadd.f32 %v3173_v33, %v1484_v8 }
 0x267   : > { %2296 = vpow2.f32 %v2019_v38  ;;  %v2006_v42 = vmul.f32 -1.442695, %v1525_v10  ;;  %v2020_v58 = vmul.f32 -1.442695, %v3276_v20 }
 0x268   : > { %2298 = vpow2.f32 %v2005_v43  ;;  %v2004_v49 = vmul.f32 -1.442695, %v1523_v44 }
 0x269   : > { %2300 = vpow2.f32 %v2003_v15 }
 0x26a   : > { %2302 = vpow2.f32 %v2006_v42 }
 0x26b   : > { %2304 = vpow2.f32 %v2022_v56 }
 0x26c   : > { %2306 = vpow2.f32 %v2004_v49 }
 0x26d   : > { %2308 = vpow2.f32 %v2020_v58 }
 0x270   : > { %v2295_v11 = vpop.eup %2294 }
 0x271   : > { %v2297_v22 = vpop.eup %2296  ;;  %v1668_v55 = vadd.f32 1.0, %v2295_v11 }
 0x272   : > { %v2299_v14 = vpop.eup %2298  ;;  %v1666_v3 = vadd.f32 1.0, %v2297_v22 }
 0x273   : > { %v2301_v61 = vpop.eup %2300  ;;  %v1652_v26 = vadd.f32 1.0, %v2299_v14  ;;  %2310 = vrcp.f32 %v1668_v55 }
 0x274   : > { %v2303_v5 = vpop.eup %2302  ;;  %v1650_v33 = vadd.f32 1.0, %v2301_v61  ;;  %2312 = vrcp.f32 %v1666_v3 }
 0x275   : > { %v2305_v31 = vpop.eup %2304  ;;  %2314 = vrcp.f32 %v1652_v26  ;;  %v1653_v41 = vadd.f32 1.0, %v2303_v5 }
 0x276   : > { %v2307_v63 = vpop.eup %2306  ;;  %2316 = vrcp.f32 %v1650_v33  ;;  %v1669_v28 = vadd.f32 1.0, %v2305_v31 }
 0x277   : > { %v2309_v45 = vpop.eup %2308  ;;  %2318 = vrcp.f32 %v1653_v41  ;;  %v1651_v9 = vadd.f32 1.0, %v2307_v63 }
 0x278   : > { %2320 = vrcp.f32 %v1669_v28  ;;  %v1667_v16 = vadd.f32 1.0, %v2309_v45 }
 0x279   : > { %2322 = vrcp.f32 %v1651_v9 }
 0x27a   : > { %2324 = vrcp.f32 %v1667_v16 }
 0x27d   : > { %v2311_v54 = vpop.eup %2310 }
 0x27e   : > { %v2313_v36 = vpop.eup %2312  ;;  %v1764_v4 = vmul.f32 %v2311_v54, %v1540_v35 }
 0x27f   : > { %v2315_v21 = vpop.eup %2314  ;;  %v1762_v13 = vmul.f32 %v2313_v36, %v1538_v6 }
 0x280   : > { %v2317_v17 = vpop.eup %2316  ;;  %v1748_v25 = vmul.f32 %v2315_v21, %v1524_v34  ;;  %1796 = vst [vmem:[%s3200_s13 + $0xf0] sm:$0xff] %v1764_v4 }
 0x281   : > { %v2319_v51 = vpop.eup %2318  ;;  %v1746_v57 = vmul.f32 %v2317_v17, %v1522_v47  ;;  %1794 = vst [vmem:[%s3200_s13 + $0xe0] sm:$0xff] %v1762_v13 }
 0x282   : > { %v2321_v37 = vpop.eup %2320  ;;  %1780 = vst [vmem:[%s3200_s13 + $0x70] sm:$0xff] %v1748_v25  ;;  %v1749_v48 = vmul.f32 %v2319_v51, %v1525_v10 }
 0x283   : > { %v2323_v24 = vpop.eup %2322  ;;  %1778 = vst [vmem:[%s3200_s13 + $0x60] sm:$0xff] %v1746_v57  ;;  %v1765_v30 = vmul.f32 %v2321_v37, %v3271_v7 }
 0x284   : > { %v2325_v39 = vpop.eup %2324  ;;  %1781 = vst [vmem:[%s3200_s13 + $0x78] sm:$0xff] %v1749_v48  ;;  %v1747_v1 = vmul.f32 %v2323_v24, %v1523_v44 }
 0x285   : > { %1797 = vst [vmem:[%s3200_s13 + $0xf8] sm:$0xff] %v1765_v30  ;;  %v1763_v59 = vmul.f32 %v2325_v39, %v3276_v20 }
 0x286   : > { %1779 = vst [vmem:[%s3200_s13 + $0x68] sm:$0xff] %v1747_v1 }
 0x287   : > { %1795 = vst [vmem:[%s3200_s13 + $0xe8] sm:$0xff] %v1763_v59 }
 0x288   : > { %2340 = shalt.err (!%p2337_p5)
}
 0x289   : > { %s2341_s7 = scalar_lea.hbm %s3293_s26, 4096  ;;  %s2345_s11 = scalar_lea.hbm %s3354_s4, 8192 }
 0x28a   : > { %p2342_p6 = scmp.ne.s32.totalorder %s3293_s26, %s2341_s7  ;;  %p2346_p10 = scmp.lt.u32.totalorder %s3293_s26, %s3354_s4 }
 0x28b   : > { %p2347_p11 = scmp.lt.u32.totalorder %s2345_s11, %s2341_s7  ;;  %p2349_p13 = scmp.lt.u32.totalorder %s2341_s7, %s3293_s26 }
 0x28c   : > { %p2343_p7 = pnand %p2342_p6, %p2482_p4 }
 0x28d   : > { %p2348_p12 = por %p2347_p11, %p2346_p10 }
 0x28e   : > { %p2344_p9 = pneg %p2343_p7 }
 0x28f   : > { %p2350_p0 = por %p2349_p13, %p2348_p12 }
 0x291   : > { %p2351_p1 = pnand %p2350_p0, %p2344_p9 }
 0x293   : > { %2354 = shalt.err (!%p2351_p1)
}
 0x294   : > { %s2416_s14 = smov 128  }
 0x295   : > { %2095 = dma.vmem_to_hbm [thread:$0]  (%p2482_p4), %s3297_s21, 4096, %s3293_s26, %s3303_s18, %s2416_s14, %s2416_s14, %s2408_s9  }
 0x296 PF: > { %p2101_p2 = scmp.ge.s32.totalorder %s2405_s20, 2  ;;  %s1828_s22 = sand.u32 1, %s2385_s15  }
 0x297   : > { %s1829_s24 = scalar_lea.sflag [#allocation3], %s1828_s22 }
 0x298   : > { %p2098_p3 = pnand %p2101_p2, %p2489_p8 }
 0x29a   : > { %2380 = dma.done.wait (!%p2098_p3), %s1829_s24, 4096  }
 0x29b   : > { %2382 = vsyncadd (!%p2098_p3), %s1829_s24, 4294963200  ;;  %s17_s20 = sadd.s32 1, %s2405_s20   ;;  %s3357_s15 = smov %s2389_s16 }
 0x29c   : > { %p14_p5 = scmp.ge.s32.totalorder %s17_s20, 4   ;;  %s3358_s16 = smov %s2393_s17 }
 0x29d   : > { %s3359_s17 = smov %s2495_s28  ;;  %s3360_s18 = smov %s2401_s19 }
 0x29e   : > { %s3361_s19 = smov %s3363_s23  ;;  %16 = sbr.rel (!%p14_p5) target bundleno = 4 (0x4), region = 80 }
 0x2a5   :  { %1834 = vsyncpa [#allocation3], 1 }
 0x2a6   :  { %1836 = vsyncpa [#allocation3 + $0x1], 1 }

</bundles_post_ra>
